<compile_context>
chip_gen: v7x
topology: tpu7x:2x2x1
jax: 0.10.0
libtpu: 0.0.40
codegen_flags: <defaults>
</compile_context>

<pallas_src>
import math

import jax
import jax.numpy as jnp
from jax.experimental import pallas as pl
from jax.experimental.pallas import tpu as pltpu


def _round_up(n, m):
    return ((n + m - 1) // m) * m


def _cdiv(a, b):
    return -(-a // b)


def fnet6_4_kernel(vx_ref, ax_ref, w_fc1_ref, w_sq_ref, w_fc2_ref, w3_ref, b_ref,
                   scal_ref, attx_ref, vo1_ref, axo_ref):
    f32 = jnp.float32
    bf16 = jnp.bfloat16

    # Bias slab rows: 0=fc1, 1=afc, 2=am_fc1, 3=am_fc2, 4=attfc2, 5=vfc2, 6=afc2,
    # 7=packed 64->scalar head biases (cols 0/1/2).
    b_fc1 = b_ref[0:1, :]
    b_afc = b_ref[1:2, :]
    b_am1 = b_ref[2:3, :]
    b_am2 = b_ref[3:4, :]
    b_att2 = b_ref[4:5, 0:64]
    b_v2 = b_ref[5:6, 0:64]
    b_a2 = b_ref[6:7, 0:64]
    b3 = b_ref[7:8, 0:8]

    # Square-weight slab columns (lane-tile-aligned static slices):
    # 0:128=afc, 128:256=AM fc1 (vo1 half), 256:384=AM fc1 (ax half), 384:512=AM fc2.
    w_afc = w_sq_ref[:, 0:128]
    w_am1v = w_sq_ref[:, 128:256]
    w_am1a = w_sq_ref[:, 256:384]
    w_am2 = w_sq_ref[:, 384:512]

    # Trunk projections (bf16 MXU operands, f32 accumulate, f32 bias+ReLU).
    vo1 = jnp.maximum(
        jnp.dot(vx_ref[...], w_fc1_ref[...], preferred_element_type=f32) + b_fc1, 0.0)
    axh = jnp.maximum(
        jnp.dot(ax_ref[...], w_afc, preferred_element_type=f32) + b_afc, 0.0)
    vo1_bf = vo1.astype(bf16)
    axh_bf = axh.astype(bf16)

    # Attention unit: fc2(relu(fc1(concat(vo1, axh)))) with the concat replaced
    # by two K=128 dots (mathematically identical, no VMEM copy).
    am_h = jnp.maximum(
        jnp.dot(vo1_bf, w_am1v, preferred_element_type=f32)
        + jnp.dot(axh_bf, w_am1a, preferred_element_type=f32)
        + b_am1, 0.0)
    att_x = jnp.dot(am_h.astype(bf16), w_am2, preferred_element_type=f32) + b_am2
    attx_bf = att_x.astype(bf16)

    # Three heads, 128 -> 64 hidden (f32 bias+ReLU), then 64 -> scalar packed
    # into an 8-lane output (col 0 = att_out, 1 = vout, 2 = aout).
    h_att = jnp.maximum(
        jnp.dot(attx_bf, w_fc2_ref[0], preferred_element_type=f32) + b_att2, 0.0)
    h_v = jnp.maximum(
        jnp.dot(vo1_bf, w_fc2_ref[1], preferred_element_type=f32) + b_v2, 0.0)
    h_a = jnp.maximum(
        jnp.dot(axh_bf, w_fc2_ref[2], preferred_element_type=f32) + b_a2, 0.0)

    scal = (jnp.dot(h_att.astype(bf16), w3_ref[0:64, :], preferred_element_type=f32)
            + jnp.dot(h_v.astype(bf16), w3_ref[64:128, :], preferred_element_type=f32)
            + jnp.dot(h_a.astype(bf16), w3_ref[128:192, :], preferred_element_type=f32)
            + b3)                                                        # [TN, 8]

    scal_ref[...] = scal.astype(scal_ref.dtype)
    attx_ref[...] = attx_bf.astype(attx_ref.dtype)
    vo1_ref[...] = vo1_bf.astype(vo1_ref.dtype)
    axo_ref[...] = axh_bf.astype(axo_ref.dtype)


def fnet6_4(vx, ax, params, *, row_tile=1024, out_dtype=jnp.bfloat16):
    """vx: [..., feature_dim], ax: [..., 128].  Returns the 6-tuple of FNet6_4.

    Compute is bf16 on the MXU with f32 accumulation; att_out/vout/aout are
    returned as f32, att_x/vo1/relu(afc(ax)) as `out_dtype` (default bf16).
    """
    p = params
    bf16 = jnp.bfloat16
    f32 = jnp.float32

    lead = vx.shape[:-1]
    d_v = vx.shape[-1]
    assert ax.shape[:-1] == lead and ax.shape[-1] == 128

    n = math.prod(lead) if lead else 1
    vx2 = vx.reshape(n, d_v).astype(bf16)
    ax2 = ax.reshape(n, 128).astype(bf16)

    # ---- weight prep (plain JAX glue, outside the kernel) -------------------
    w_fc1 = p["fc1_w"].T.astype(bf16)                                   # [512,128]

    # Four 128x128 square weights hstacked into one resident slab.
    w_sq = jnp.concatenate(
        [p["afc_w"].T,
         p["am_fc1_w"][:, :128].T,        # AM fc1, vo1 half (exact concat split)
         p["am_fc1_w"][:, 128:].T,        # AM fc1, ax half
         p["am_fc2_w"].T],
        axis=1).astype(bf16)                                            # [128,512]

    # Three 128x64 head-hidden weights stacked along a leading axis.
    w_fc2 = jnp.stack(
        [p["attfc2_w"].T, p["vfc2_w"].T, p["afc2_w"].T]).astype(bf16)   # [3,128,64]

    # Three 64->1 head weights packed into one [192, 8] slab (cols 0/1/2).
    w3 = jnp.zeros((192, 8), f32)
    w3 = w3.at[0:64, 0].set(p["attfc3_w"][0])
    w3 = w3.at[64:128, 1].set(p["vfc3_w"][0])
    w3 = w3.at[128:192, 2].set(p["afc3_w"][0])
    w3 = w3.astype(bf16)

    # All biases in one f32 [8,128] slab (added in f32 on the VPU).
    b_slab = jnp.zeros((8, 128), f32)
    b_slab = b_slab.at[0, :].set(p["fc1_b"])
    b_slab = b_slab.at[1, :].set(p["afc_b"])
    b_slab = b_slab.at[2, :].set(p["am_fc1_b"])
    b_slab = b_slab.at[3, :].set(p["am_fc2_b"])
    b_slab = b_slab.at[4, 0:64].set(p["attfc2_b"])
    b_slab = b_slab.at[5, 0:64].set(p["vfc2_b"])
    b_slab = b_slab.at[6, 0:64].set(p["afc2_b"])
    b_slab = b_slab.at[7, 0].set(p["attfc3_b"][0])
    b_slab = b_slab.at[7, 1].set(p["vfc3_b"][0])
    b_slab = b_slab.at[7, 2].set(p["afc3_b"][0])

    weights = [w_fc1, w_sq, w_fc2, w3, b_slab]

    # ---- row tiling ----------------------------------------------------------
    # Target >= ~4 grid steps (so v7x's 2 TCs get work and the pipeline overlaps),
    # capped at row_tile; tn is a multiple of 16 (bf16 sublane tile).
    tn = min(row_tile, max(16, _round_up(_cdiv(n, 4), 16)))
    n_pad = _round_up(n, tn)
    if n_pad != n:
        vx2 = jnp.pad(vx2, ((0, n_pad - n), (0, 0)))
        ax2 = jnp.pad(ax2, ((0, n_pad - n), (0, 0)))
    grid = (n_pad // tn,)

    def row_spec(d):
        return pl.BlockSpec((tn, d), lambda i: (i, 0))

    def resident(x):
        nd = x.ndim
        return pl.BlockSpec(x.shape, lambda i, nd=nd: (0,) * nd)

    out_shapes = (
        jax.ShapeDtypeStruct((n_pad, 8), out_dtype),     # packed scalar heads
        jax.ShapeDtypeStruct((n_pad, 128), out_dtype),   # att_x
        jax.ShapeDtypeStruct((n_pad, 128), out_dtype),   # vo1
        jax.ShapeDtypeStruct((n_pad, 128), out_dtype),   # relu(afc(ax))
    )

    scal, att_x, vo1, axo = pl.pallas_call(
        fnet6_4_kernel,
        out_shape=out_shapes,
        grid=grid,
        in_specs=[row_spec(d_v), row_spec(128)] + [resident(w) for w in weights],
        out_specs=(row_spec(8), row_spec(128), row_spec(128), row_spec(128)),
        compiler_params=pltpu.CompilerParams(
            dimension_semantics=("parallel",)),
    )(vx2, ax2, *weights)

    att_out = scal[:n, 0:1].astype(f32).reshape(*lead, 1)
    vout = scal[:n, 1:2].astype(f32).reshape(*lead, 1)
    aout = scal[:n, 2:3].astype(f32).reshape(*lead, 1)
    att_x = att_x[:n].reshape(*lead, 128)
    vo1 = vo1[:n].reshape(*lead, 128)
    axo = axo[:n].reshape(*lead, 128)
    return att_out, vout, aout, att_x, vo1, axo


# ---------------------------------------------------------------------------
# Parameter init (nn.Linear convention: weight (out, in), bias (out)) & reference
# ---------------------------------------------------------------------------
def _linear_init(key, out_dim, in_dim):
    kw, kb = jax.random.split(key)
    lim = 1.0 / math.sqrt(in_dim)
    w = jax.random.uniform(kw, (out_dim, in_dim), jnp.float32, -lim, lim)
    b = jax.random.uniform(kb, (out_dim,), jnp.float32, -lim, lim)
    return w, b


def init_params(key, feature_dim=512):
    keys = jax.random.split(key, 10)
    p = {}
    p["fc1_w"], p["fc1_b"] = _linear_init(keys[0], 128, feature_dim)
    p["afc_w"], p["afc_b"] = _linear_init(keys[1], 128, 128)
    p["am_fc1_w"], p["am_fc1_b"] = _linear_init(keys[2], 128, 256)   # AM fusion MLP
    p["am_fc2_w"], p["am_fc2_b"] = _linear_init(keys[3], 128, 128)
    p["attfc2_w"], p["attfc2_b"] = _linear_init(keys[4], 64, 128)
    p["attfc3_w"], p["attfc3_b"] = _linear_init(keys[5], 1, 64)
    p["vfc2_w"], p["vfc2_b"] = _linear_init(keys[6], 64, 128)
    p["vfc3_w"], p["vfc3_b"] = _linear_init(keys[7], 1, 64)
    p["afc2_w"], p["afc2_b"] = _linear_init(keys[8], 64, 128)
    p["afc3_w"], p["afc3_b"] = _linear_init(keys[9], 1, 64)
    return p


def reference(vx, ax, p):
    vo1 = jnp.maximum(vx @ p["fc1_w"].T + p["fc1_b"], 0.0)
    axh = jnp.maximum(ax @ p["afc_w"].T + p["afc_b"], 0.0)
    cat = jnp.concatenate([vo1, axh], axis=-1)
    am_h = jnp.maximum(cat @ p["am_fc1_w"].T + p["am_fc1_b"], 0.0)
    att_x = am_h @ p["am_fc2_w"].T + p["am_fc2_b"]
    att_out = (jnp.maximum(att_x @ p["attfc2_w"].T + p["attfc2_b"], 0.0)
               @ p["attfc3_w"].T + p["attfc3_b"])
    vout = (jnp.maximum(vo1 @ p["vfc2_w"].T + p["vfc2_b"], 0.0)
            @ p["vfc3_w"].T + p["vfc3_b"])
    aout = (jnp.maximum(axh @ p["afc2_w"].T + p["afc2_b"], 0.0)
            @ p["afc3_w"].T + p["afc3_b"])
    return att_out, vout, aout, att_x, vo1, axh


if __name__ == "__main__":
    key = jax.random.PRNGKey(0)
    kp, kv, ka = jax.random.split(key, 3)

    feature_dim = 512           # module default
    batch, seq = 4, 30          # 120 rows -> tn=32, grid=(4,), exercises padding

    params = init_params(kp, feature_dim)
    # Realistic deployment: caller holds bf16 activations at the HBM boundary.
    vx = jax.random.normal(kv, (batch, seq, feature_dim), jnp.float32).astype(jnp.bfloat16)
    ax = jax.random.normal(ka, (batch, seq, 128), jnp.float32).astype(jnp.bfloat16)

    outs = fnet6_4(vx, ax, params)
    outs = jax.block_until_ready(outs)

    refs = reference(vx.astype(jnp.float32), ax.astype(jnp.float32), params)
    expected_shapes = [(batch, seq, 1)] * 3 + [(batch, seq, 128)] * 3
    for o, r, s in zip(outs, refs, expected_shapes):
        assert o.shape == s, (o.shape, s)
        o32 = jnp.asarray(o, jnp.float32)
        # bf16 operands / bf16 outputs -> loosened tolerance vs. the f32 reference.
        assert jnp.allclose(o32, r, atol=5e-2, rtol=5e-2), float(jnp.max(jnp.abs(o32 - r)))

    print("KERNEL_OK")
</pallas_src>

<mosaic_0001>
module attributes {stable_mosaic.version = 11 : i64} {
  func.func @fnet6_4_kernel(%arg0: i32, %arg1: memref<32x512xbf16, #tpu.memory_space<vmem>>, %arg2: memref<32x128xbf16, #tpu.memory_space<vmem>>, %arg3: memref<512x128xbf16, #tpu.memory_space<vmem>>, %arg4: memref<128x512xbf16, #tpu.memory_space<vmem>>, %arg5: memref<3x128x64xbf16, #tpu.memory_space<vmem>>, %arg6: memref<192x8xbf16, #tpu.memory_space<vmem>>, %arg7: memref<8x128xf32, #tpu.memory_space<vmem>>, %arg8: memref<32x8xbf16, #tpu.memory_space<vmem>>, %arg9: memref<32x128xbf16, #tpu.memory_space<vmem>>, %arg10: memref<32x128xbf16, #tpu.memory_space<vmem>>, %arg11: memref<32x128xbf16, #tpu.memory_space<vmem>>) attributes {dimension_semantics = [#tpu.dimension_semantics<parallel>], iteration_bounds = array<i64: 4>, scalar_prefetch = 0 : i64, scratch_operands = 0 : i64, tpu.core_type = #tpu.core_type<tc>, window_params = [{transform_indices = @transform_0, window_bounds = array<i64: 32, 512>}, {transform_indices = @transform_1, window_bounds = array<i64: 32, 128>}, {pipeline_mode = #tpu.pipeline_mode<synchronous>, transform_indices = @transform_2, window_bounds = array<i64: 512, 128>}, {pipeline_mode = #tpu.pipeline_mode<synchronous>, transform_indices = @transform_3, window_bounds = array<i64: 128, 512>}, {pipeline_mode = #tpu.pipeline_mode<synchronous>, transform_indices = @transform_4, window_bounds = array<i64: 3, 128, 64>}, {pipeline_mode = #tpu.pipeline_mode<synchronous>, transform_indices = @transform_5, window_bounds = array<i64: 192, 8>}, {pipeline_mode = #tpu.pipeline_mode<synchronous>, transform_indices = @transform_6, window_bounds = array<i64: 8, 128>}, {transform_indices = @transform_7, window_bounds = array<i64: 32, 8>}, {transform_indices = @transform_8, window_bounds = array<i64: 32, 128>}, {transform_indices = @transform_9, window_bounds = array<i64: 32, 128>}, {transform_indices = @transform_10, window_bounds = array<i64: 32, 128>}]} {
    %c0 = arith.constant 0 : index
    %c0_0 = arith.constant 0 : index
    %0 = vector.load %arg7[%c0, %c0_0] : memref<8x128xf32, #tpu.memory_space<vmem>>, vector<1x128xf32>
    %c1 = arith.constant 1 : index
    %c0_1 = arith.constant 0 : index
    %1 = vector.load %arg7[%c1, %c0_1] : memref<8x128xf32, #tpu.memory_space<vmem>>, vector<1x128xf32>
    %c2 = arith.constant 2 : index
    %c0_2 = arith.constant 0 : index
    %2 = vector.load %arg7[%c2, %c0_2] : memref<8x128xf32, #tpu.memory_space<vmem>>, vector<1x128xf32>
    %c3 = arith.constant 3 : index
    %c0_3 = arith.constant 0 : index
    %3 = vector.load %arg7[%c3, %c0_3] : memref<8x128xf32, #tpu.memory_space<vmem>>, vector<1x128xf32>
    %c4 = arith.constant 4 : index
    %c0_4 = arith.constant 0 : index
    %4 = vector.load %arg7[%c4, %c0_4] : memref<8x128xf32, #tpu.memory_space<vmem>>, vector<1x64xf32>
    %c5 = arith.constant 5 : index
    %c0_5 = arith.constant 0 : index
    %5 = vector.load %arg7[%c5, %c0_5] : memref<8x128xf32, #tpu.memory_space<vmem>>, vector<1x64xf32>
    %c6 = arith.constant 6 : index
    %c0_6 = arith.constant 0 : index
    %6 = vector.load %arg7[%c6, %c0_6] : memref<8x128xf32, #tpu.memory_space<vmem>>, vector<1x64xf32>
    %c7 = arith.constant 7 : index
    %c0_7 = arith.constant 0 : index
    %7 = vector.load %arg7[%c7, %c0_7] : memref<8x128xf32, #tpu.memory_space<vmem>>, vector<1x8xf32>
    %c0_8 = arith.constant 0 : index
    %c0_9 = arith.constant 0 : index
    %8 = vector.load %arg4[%c0_8, %c0_9] : memref<128x512xbf16, #tpu.memory_space<vmem>>, vector<128x128xbf16>
    %c0_10 = arith.constant 0 : index
    %c128 = arith.constant 128 : index
    %9 = vector.load %arg4[%c0_10, %c128] : memref<128x512xbf16, #tpu.memory_space<vmem>>, vector<128x128xbf16>
    %c0_11 = arith.constant 0 : index
    %c256 = arith.constant 256 : index
    %10 = vector.load %arg4[%c0_11, %c256] : memref<128x512xbf16, #tpu.memory_space<vmem>>, vector<128x128xbf16>
    %c0_12 = arith.constant 0 : index
    %c384 = arith.constant 384 : index
    %11 = vector.load %arg4[%c0_12, %c384] : memref<128x512xbf16, #tpu.memory_space<vmem>>, vector<128x128xbf16>
    %c0_13 = arith.constant 0 : index
    %c0_14 = arith.constant 0 : index
    %12 = vector.load %arg1[%c0_13, %c0_14] : memref<32x512xbf16, #tpu.memory_space<vmem>>, vector<32x512xbf16>
    %c0_15 = arith.constant 0 : index
    %c0_16 = arith.constant 0 : index
    %13 = vector.load %arg3[%c0_15, %c0_16] : memref<512x128xbf16, #tpu.memory_space<vmem>>, vector<512x128xbf16>
    %cst = arith.constant dense<0.000000e+00> : vector<32x128xf32>
    %14 = tpu.matmul %12, %13, %cst {dimension_numbers = #tpu.dot_dimension_numbers<[1], [0], [0], [1], [0, 0, 1, 1], [], []>} : vector<32x512xbf16>, vector<512x128xbf16>, vector<32x128xf32> -> vector<32x128xf32>
    %15 = vector.broadcast %0 : vector<1x128xf32> to vector<32x128xf32>
    %16 = arith.addf %14, %15 : vector<32x128xf32>
    %cst_17 = arith.constant 0.000000e+00 : f32
    %17 = vector.broadcast %cst_17 : f32 to vector<32x128xf32>
    %18 = arith.maximumf %16, %17 : vector<32x128xf32>
    %c0_18 = arith.constant 0 : index
    %c0_19 = arith.constant 0 : index
    %19 = vector.load %arg2[%c0_18, %c0_19] : memref<32x128xbf16, #tpu.memory_space<vmem>>, vector<32x128xbf16>
    %cst_20 = arith.constant dense<0.000000e+00> : vector<32x128xf32>
    %20 = tpu.matmul %19, %8, %cst_20 {dimension_numbers = #tpu.dot_dimension_numbers<[1], [0], [0], [1], [0, 0, 1, 1], [], []>} : vector<32x128xbf16>, vector<128x128xbf16>, vector<32x128xf32> -> vector<32x128xf32>
    %21 = vector.broadcast %1 : vector<1x128xf32> to vector<32x128xf32>
    %22 = arith.addf %20, %21 : vector<32x128xf32>
    %cst_21 = arith.constant 0.000000e+00 : f32
    %23 = vector.broadcast %cst_21 : f32 to vector<32x128xf32>
    %24 = arith.maximumf %22, %23 : vector<32x128xf32>
    %25 = arith.truncf %18 : vector<32x128xf32> to vector<32x128xbf16>
    %26 = arith.truncf %24 : vector<32x128xf32> to vector<32x128xbf16>
    %cst_22 = arith.constant dense<0.000000e+00> : vector<32x128xf32>
    %27 = tpu.matmul %25, %9, %cst_22 {dimension_numbers = #tpu.dot_dimension_numbers<[1], [0], [0], [1], [0, 0, 1, 1], [], []>} : vector<32x128xbf16>, vector<128x128xbf16>, vector<32x128xf32> -> vector<32x128xf32>
    %cst_23 = arith.constant dense<0.000000e+00> : vector<32x128xf32>
    %28 = tpu.matmul %26, %10, %cst_23 {dimension_numbers = #tpu.dot_dimension_numbers<[1], [0], [0], [1], [0, 0, 1, 1], [], []>} : vector<32x128xbf16>, vector<128x128xbf16>, vector<32x128xf32> -> vector<32x128xf32>
    %29 = arith.addf %27, %28 : vector<32x128xf32>
    %30 = vector.broadcast %2 : vector<1x128xf32> to vector<32x128xf32>
    %31 = arith.addf %29, %30 : vector<32x128xf32>
    %cst_24 = arith.constant 0.000000e+00 : f32
    %32 = vector.broadcast %cst_24 : f32 to vector<32x128xf32>
    %33 = arith.maximumf %31, %32 : vector<32x128xf32>
    %34 = arith.truncf %33 : vector<32x128xf32> to vector<32x128xbf16>
    %cst_25 = arith.constant dense<0.000000e+00> : vector<32x128xf32>
    %35 = tpu.matmul %34, %11, %cst_25 {dimension_numbers = #tpu.dot_dimension_numbers<[1], [0], [0], [1], [0, 0, 1, 1], [], []>} : vector<32x128xbf16>, vector<128x128xbf16>, vector<32x128xf32> -> vector<32x128xf32>
    %36 = vector.broadcast %3 : vector<1x128xf32> to vector<32x128xf32>
    %37 = arith.addf %35, %36 : vector<32x128xf32>
    %38 = arith.truncf %37 : vector<32x128xf32> to vector<32x128xbf16>
    %c0_26 = arith.constant 0 : index
    %c0_27 = arith.constant 0 : index
    %c0_28 = arith.constant 0 : index
    %39 = vector.load %arg5[%c0_26, %c0_27, %c0_28] : memref<3x128x64xbf16, #tpu.memory_space<vmem>>, vector<1x128x64xbf16>
    %40 = vector.shape_cast %39 : vector<1x128x64xbf16> to vector<128x64xbf16>
    %cst_29 = arith.constant dense<0.000000e+00> : vector<32x64xf32>
    %41 = tpu.matmul %38, %40, %cst_29 {dimension_numbers = #tpu.dot_dimension_numbers<[1], [0], [0], [1], [0, 0, 1, 1], [], []>} : vector<32x128xbf16>, vector<128x64xbf16>, vector<32x64xf32> -> vector<32x64xf32>
    %42 = vector.broadcast %4 : vector<1x64xf32> to vector<32x64xf32>
    %43 = arith.addf %41, %42 : vector<32x64xf32>
    %cst_30 = arith.constant 0.000000e+00 : f32
    %44 = vector.broadcast %cst_30 : f32 to vector<32x64xf32>
    %45 = arith.maximumf %43, %44 : vector<32x64xf32>
    %c1_31 = arith.constant 1 : index
    %c0_32 = arith.constant 0 : index
    %c0_33 = arith.constant 0 : index
    %46 = vector.load %arg5[%c1_31, %c0_32, %c0_33] : memref<3x128x64xbf16, #tpu.memory_space<vmem>>, vector<1x128x64xbf16>
    %47 = vector.shape_cast %46 : vector<1x128x64xbf16> to vector<128x64xbf16>
    %cst_34 = arith.constant dense<0.000000e+00> : vector<32x64xf32>
    %48 = tpu.matmul %25, %47, %cst_34 {dimension_numbers = #tpu.dot_dimension_numbers<[1], [0], [0], [1], [0, 0, 1, 1], [], []>} : vector<32x128xbf16>, vector<128x64xbf16>, vector<32x64xf32> -> vector<32x64xf32>
    %49 = vector.broadcast %5 : vector<1x64xf32> to vector<32x64xf32>
    %50 = arith.addf %48, %49 : vector<32x64xf32>
    %cst_35 = arith.constant 0.000000e+00 : f32
    %51 = vector.broadcast %cst_35 : f32 to vector<32x64xf32>
    %52 = arith.maximumf %50, %51 : vector<32x64xf32>
    %c2_36 = arith.constant 2 : index
    %c0_37 = arith.constant 0 : index
    %c0_38 = arith.constant 0 : index
    %53 = vector.load %arg5[%c2_36, %c0_37, %c0_38] : memref<3x128x64xbf16, #tpu.memory_space<vmem>>, vector<1x128x64xbf16>
    %54 = vector.shape_cast %53 : vector<1x128x64xbf16> to vector<128x64xbf16>
    %cst_39 = arith.constant dense<0.000000e+00> : vector<32x64xf32>
    %55 = tpu.matmul %26, %54, %cst_39 {dimension_numbers = #tpu.dot_dimension_numbers<[1], [0], [0], [1], [0, 0, 1, 1], [], []>} : vector<32x128xbf16>, vector<128x64xbf16>, vector<32x64xf32> -> vector<32x64xf32>
    %56 = vector.broadcast %6 : vector<1x64xf32> to vector<32x64xf32>
    %57 = arith.addf %55, %56 : vector<32x64xf32>
    %cst_40 = arith.constant 0.000000e+00 : f32
    %58 = vector.broadcast %cst_40 : f32 to vector<32x64xf32>
    %59 = arith.maximumf %57, %58 : vector<32x64xf32>
    %60 = arith.truncf %45 : vector<32x64xf32> to vector<32x64xbf16>
    %c0_41 = arith.constant 0 : index
    %c0_42 = arith.constant 0 : index
    %61 = vector.load %arg6[%c0_41, %c0_42] : memref<192x8xbf16, #tpu.memory_space<vmem>>, vector<64x8xbf16>
    %cst_43 = arith.constant dense<0.000000e+00> : vector<32x8xf32>
    %62 = tpu.matmul %60, %61, %cst_43 {dimension_numbers = #tpu.dot_dimension_numbers<[1], [0], [0], [1], [0, 0, 1, 1], [], []>} : vector<32x64xbf16>, vector<64x8xbf16>, vector<32x8xf32> -> vector<32x8xf32>
    %63 = arith.truncf %52 : vector<32x64xf32> to vector<32x64xbf16>
    %c64 = arith.constant 64 : index
    %c0_44 = arith.constant 0 : index
    %64 = vector.load %arg6[%c64, %c0_44] : memref<192x8xbf16, #tpu.memory_space<vmem>>, vector<64x8xbf16>
    %cst_45 = arith.constant dense<0.000000e+00> : vector<32x8xf32>
    %65 = tpu.matmul %63, %64, %cst_45 {dimension_numbers = #tpu.dot_dimension_numbers<[1], [0], [0], [1], [0, 0, 1, 1], [], []>} : vector<32x64xbf16>, vector<64x8xbf16>, vector<32x8xf32> -> vector<32x8xf32>
    %66 = arith.addf %62, %65 : vector<32x8xf32>
    %67 = arith.truncf %59 : vector<32x64xf32> to vector<32x64xbf16>
    %c128_46 = arith.constant 128 : index
    %c0_47 = arith.constant 0 : index
    %68 = vector.load %arg6[%c128_46, %c0_47] : memref<192x8xbf16, #tpu.memory_space<vmem>>, vector<64x8xbf16>
    %cst_48 = arith.constant dense<0.000000e+00> : vector<32x8xf32>
    %69 = tpu.matmul %67, %68, %cst_48 {dimension_numbers = #tpu.dot_dimension_numbers<[1], [0], [0], [1], [0, 0, 1, 1], [], []>} : vector<32x64xbf16>, vector<64x8xbf16>, vector<32x8xf32> -> vector<32x8xf32>
    %70 = arith.addf %66, %69 : vector<32x8xf32>
    %71 = vector.broadcast %7 : vector<1x8xf32> to vector<32x8xf32>
    %72 = arith.addf %70, %71 : vector<32x8xf32>
    %73 = arith.truncf %72 : vector<32x8xf32> to vector<32x8xbf16>
    %c0_49 = arith.constant 0 : index
    %c0_50 = arith.constant 0 : index
    %74 = vector.load %arg8[%c0_49, %c0_50] : memref<32x8xbf16, #tpu.memory_space<vmem>>, vector<32x8xbf16>
    tpu.vector_store %arg8[%c0_49, %c0_50], %73 {strides = array<i32>} : memref<32x8xbf16, #tpu.memory_space<vmem>>, vector<32x8xbf16>,
    %c0_51 = arith.constant 0 : index
    %c0_52 = arith.constant 0 : index
    %75 = vector.load %arg9[%c0_51, %c0_52] : memref<32x128xbf16, #tpu.memory_space<vmem>>, vector<32x128xbf16>
    tpu.vector_store %arg9[%c0_51, %c0_52], %38 {strides = array<i32>} : memref<32x128xbf16, #tpu.memory_space<vmem>>, vector<32x128xbf16>,
    %c0_53 = arith.constant 0 : index
    %c0_54 = arith.constant 0 : index
    %76 = vector.load %arg10[%c0_53, %c0_54] : memref<32x128xbf16, #tpu.memory_space<vmem>>, vector<32x128xbf16>
    tpu.vector_store %arg10[%c0_53, %c0_54], %25 {strides = array<i32>} : memref<32x128xbf16, #tpu.memory_space<vmem>>, vector<32x128xbf16>,
    %c0_55 = arith.constant 0 : index
    %c0_56 = arith.constant 0 : index
    %77 = vector.load %arg11[%c0_55, %c0_56] : memref<32x128xbf16, #tpu.memory_space<vmem>>, vector<32x128xbf16>
    tpu.vector_store %arg11[%c0_55, %c0_56], %26 {strides = array<i32>} : memref<32x128xbf16, #tpu.memory_space<vmem>>, vector<32x128xbf16>,
    return
  }
  func.func @transform_0(%arg0: i32) -> (i32, i32) {
    %c0_i32 = arith.constant 0 : i32
    %c0_i32_0 = arith.constant 0 : i32
    return %arg0, %c0_i32 : i32, i32
  }
  func.func @transform_1(%arg0: i32) -> (i32, i32) {
    %c0_i32 = arith.constant 0 : i32
    %c0_i32_0 = arith.constant 0 : i32
    return %arg0, %c0_i32 : i32, i32
  }
  func.func @transform_2(%arg0: i32) -> (i32, i32) {
    %c0_i32 = arith.constant 0 : i32
    %c0_i32_0 = arith.constant 0 : i32
    %c0_i32_1 = arith.constant 0 : i32
    return %c0_i32, %c0_i32_0 : i32, i32
  }
  func.func @transform_3(%arg0: i32) -> (i32, i32) {
    %c0_i32 = arith.constant 0 : i32
    %c0_i32_0 = arith.constant 0 : i32
    %c0_i32_1 = arith.constant 0 : i32
    return %c0_i32, %c0_i32_0 : i32, i32
  }
  func.func @transform_4(%arg0: i32) -> (i32, i32, i32) {
    %c0_i32 = arith.constant 0 : i32
    %c0_i32_0 = arith.constant 0 : i32
    %c0_i32_1 = arith.constant 0 : i32
    %c0_i32_2 = arith.constant 0 : i32
    return %c0_i32, %c0_i32_0, %c0_i32_1 : i32, i32, i32
  }
  func.func @transform_5(%arg0: i32) -> (i32, i32) {
    %c0_i32 = arith.constant 0 : i32
    %c0_i32_0 = arith.constant 0 : i32
    %c0_i32_1 = arith.constant 0 : i32
    return %c0_i32, %c0_i32_0 : i32, i32
  }
  func.func @transform_6(%arg0: i32) -> (i32, i32) {
    %c0_i32 = arith.constant 0 : i32
    %c0_i32_0 = arith.constant 0 : i32
    %c0_i32_1 = arith.constant 0 : i32
    return %c0_i32, %c0_i32_0 : i32, i32
  }
  func.func @transform_7(%arg0: i32) -> (i32, i32) {
    %c0_i32 = arith.constant 0 : i32
    %c0_i32_0 = arith.constant 0 : i32
    return %arg0, %c0_i32 : i32, i32
  }
  func.func @transform_8(%arg0: i32) -> (i32, i32) {
    %c0_i32 = arith.constant 0 : i32
    %c0_i32_0 = arith.constant 0 : i32
    return %arg0, %c0_i32 : i32, i32
  }
  func.func @transform_9(%arg0: i32) -> (i32, i32) {
    %c0_i32 = arith.constant 0 : i32
    %c0_i32_0 = arith.constant 0 : i32
    return %arg0, %c0_i32 : i32, i32
  }
  func.func @transform_10(%arg0: i32) -> (i32, i32) {
    %c0_i32 = arith.constant 0 : i32
    %c0_i32_0 = arith.constant 0 : i32
    return %arg0, %c0_i32 : i32, i32
  }
}

</mosaic_0001>

<bundles_post_ra>
// kernel: tpu_custom_call.1
= control target key start
LH: loop header
LB: loop body
LE: loop exit
PB: predicated region body
PF: predicated region fallthrough
CT: control target
= control target key end

     0   :  { %s3945_s0 = inlined_call_operand.vmem [shape: bf16[128,512], index: 0, kind: input, shape index: {}]   ;;  %s3946_s1 = inlined_call_operand.hbm [shape: bf16[128,128], index: 1, kind: input, shape index: {}]   ;;  %s3947_s2 = inlined_call_operand.hbm [shape: bf16[512,128], index: 2, kind: input, shape index: {}]   ;;  %s3948_s3 = inlined_call_operand.hbm [shape: bf16[128,512], index: 3, kind: input, shape index: {}]   ;;  %s3949_s4 = inlined_call_operand.vmem [shape: bf16[3,128,64], index: 4, kind: input, shape index: {}]   ;;  %s3950_s5 = inlined_call_operand.vmem [shape: bf16[192,8], index: 5, kind: input, shape index: {}]   ;;  %s3951_s6 = inlined_call_operand.vmem [shape: f32[8,128], index: 6, kind: input, shape index: {}]   ;;  %s3952_s7 = inlined_call_operand.vmem [shape: bf16[128,8], index: 7, kind: output, shape index: {0}]   ;;  %s3953_s8 = inlined_call_operand.hbm [shape: bf16[128,128], index: 8, kind: output, shape index: {1}]   ;;  %s3954_s9 = inlined_call_operand.hbm [shape: bf16[128,128], index: 9, kind: output, shape index: {2}]   ;;  %s3955_s10 = inlined_call_operand.hbm [shape: bf16[128,128], index: 10, kind: output, shape index: {3}]  }
   0x1   :  { %3964 = sst [smem:[#allocation18_spill]] %s3945_s0 }
   0x2   :  { %3965 = sst [smem:[#allocation19_spill]] %s3946_s1 }
   0x3   :  { %3966 = sst [smem:[#allocation20_spill]] %s3947_s2 }
   0x4   :  { %3967 = sst [smem:[#allocation21_spill]] %s3948_s3 }
   0x5   :  { %16 = vsyncpa [#allocation3], 0 }
   0x6   :  { %18 = vsyncpa [#allocation3 + $0x1], 0 }
   0x7   :  { %19 = vsyncpa [#allocation6], 0 }
   0x8   :  { %20 = vsyncpa [#allocation4], 0 }
   0x9   :  { %22 = vsyncpa [#allocation4 + $0x1], 0 }
   0xa   :  { %23 = vsyncpa [#allocation10], 0 }
   0xb   :  { %25 = vsyncpa [#allocation10 + $0x1], 0  ;;  %s3432_s13 = smov 0   ;;  %s3434_s14 = smov 0  }
   0xc   :  { %s3436_s15 = smov 0   ;;  %s3438_s16 = smov 0  }
   0xd LB: > { %3968 = sst [smem:[#allocation16_spill]] %s3351_s13  ;;  %s3453_s17 = sadd.s32 4294967295, %s3363_s16   ;;  %s3363_s16 = sphi %s3438_s16, %s3994_s16   ;;  %s3359_s15 = sphi %s3436_s15, %s3993_s15   ;;  %s3355_s14 = sphi %s3434_s14, %s3992_s14   ;;  %s3351_s13 = sphi %s3432_s13, %s3991_s13  }
   0xe   : > { %s3959_s18 = sadd.s32 4294967294, %s3363_s16   ;;  %p77_p0 = scmp.ne.s32.totalorder %s3355_s14, %s3351_s13 }
   0xf   : > { %p3956_p1 = scmp.eq.s32.totalorder %s3453_s17, 0  ;;  %p238_p3 = scmp.eq.s32.totalorder %s3959_s18, 3 }
  0x10   : > { %p2362_p5 = scmp.ge.s32.totalorder %s3363_s16, 1  ;;  %p297_p7 = scmp.lt.s32.totalorder %s3363_s16, 5 }
  0x11   : > { %p3464_p4 = por %p3956_p1, %p77_p0  ;;  %p3469_p6 = por %p238_p3, %p77_p0 }
  0x12   : > { %p3474_p8 = pnand %p2362_p5, %p297_p7  ;;  %s3365_s22 = smov [#allocation5]  }
  0x13   : > { %s3969_s19 = scalar_select %p3464_p4, 1, 0 }
  0x14   : > { %s3970_s20 = scalar_select %p3469_p6, 1, 0 }
  0x15   : > { %s3972_s21 = scalar_select %p3474_p8, 1, 0 }
  0x16   : > { %3971 = sst [smem:[#allocation17_spill]] %s3970_s20  ;;  %s309_s23 = sshll.u32 %s3365_s22, 4  ;;  %s310_s23 = int_to_ptr.vmem [resolvable:$true] %s309_s23 }
  0x17   : > { %p2966_p9 = pneg %p3474_p8  ;;  %s3366_s25 = smov [#allocation7]  }
  0x18   : > { %s322_s26 = sshll.u32 %s3366_s25, 4  ;;  %s3974_s2 = sld [smem:[#allocation20_spill]]  ;;  %s3486_s26 = int_to_ptr.vmem [resolvable:$true] %s322_s26 }
  0x19   : > { %p3482_p10 = pnand %p2966_p9, %p3956_p1 }
  0x1b   : > { %p3149_p12 = pneg %p3482_p10 }
  0x1e   : > { %s3147_s29 = scalar_lea.hbm %s3974_s2, 4096 }
  0x1f   : > { %p3148_p11 = scmp.ne.s32.totalorder %s3974_s2, %s3147_s29  ;;  %p3154_p3 = scmp.lt.u32.totalorder %s3147_s29, %s3974_s2 }
  0x21   : > { %p3150_p13 = pnand %p3149_p12, %p3148_p11 }
  0x23   : > { %p3151_p0 = pneg %p3150_p13 }
  0x25   : > { %p3156_p5 = pnand %p3154_p3, %p3151_p0 }
  0x27   : > { %3159 = shalt.err (!%p3156_p5)
}
  0x28   : > { %s3160_s25 = scalar_lea.vmem %s310_s23, 4096  ;;  %p3168_p2 = scmp.lt.s32.totalorder %s310_s23, %s310_s23 }
  0x29   : > { %p3161_p7 = scmp.ne.s32.totalorder %s310_s23, %s3160_s25  ;;  %p3169_p6 = scmp.lt.s32.totalorder %s3160_s25, %s3160_s25 }
  0x2b   : > { %p3163_p9 = pnand %p3161_p7, %p3149_p12  ;;  %p3170_p4 = por %p3169_p6, %p3168_p2 }
  0x2d   : > { %p3164_p1 = pneg %p3163_p9 }
  0x2f   : > { %p3171_p8 = pnand %p3170_p4, %p3164_p1 }
  0x31   : > { %3174 = shalt.err (!%p3171_p8)
}
  0x32   : > { %s3962_s27 = smov 64   ;;  %s3963_s28 = smov 4  }
  0x33   : > { %2969 = dma.hbm_to_vmem [thread:$0]  (!%p3482_p10), %s3974_s2, 4096, %s310_s23, [#allocation6], %s3962_s27, %s3962_s27, %s3963_s28  }
  0x34   : > { %s3975_s3 = sld [smem:[#allocation21_spill]] }
  0x3a   : > { %s3175_s22 = scalar_lea.hbm %s3975_s3, 4096 }
  0x3b   : > { %p3176_p1 = scmp.ne.s32.totalorder %s3975_s3, %s3175_s22  ;;  %p3182_p6 = scmp.lt.u32.totalorder %s3175_s22, %s3975_s3 }
  0x3d   : > { %p3178_p2 = pnand %p3176_p1, %p3149_p12 }
  0x3f   : > { %p3179_p4 = pneg %p3178_p2 }
  0x41   : > { %p3184_p8 = pnand %p3182_p6, %p3179_p4 }
  0x43   : > { %3187 = shalt.err (!%p3184_p8)
}
  0x44   : > { %s3188_s23 = scalar_lea.vmem %s3486_s26, 4096  ;;  %p3196_p3 = scmp.lt.s32.totalorder %s3486_s26, %s3486_s26 }
  0x45   : > { %p3189_p11 = scmp.ne.s32.totalorder %s3486_s26, %s3188_s23  ;;  %p3197_p5 = scmp.lt.s32.totalorder %s3188_s23, %s3188_s23 }
  0x47   : > { %p3191_p13 = pnand %p3189_p11, %p3149_p12  ;;  %p3198_p7 = por %p3197_p5, %p3196_p3 }
  0x49   : > { %p3192_p0 = pneg %p3191_p13 }
  0x4b   : > { %p3199_p9 = pnand %p3198_p7, %p3192_p0 }
  0x4d   : > { %3202 = shalt.err (!%p3199_p9)
}
  0x4e   : > { %s3369_s13 = smov 256   ;;  %s3370_s18 = smov 16  }
  0x4f   : > { %2972 = dma.hbm_to_vmem [thread:$0]  (!%p3482_p10), %s3975_s3, 4096, %s3486_s26, [#allocation6], %s3369_s13, %s3369_s13, %s3370_s18  }
  0x50   : > { %s3539_s30 = sadd.s32 1, %s3363_s16   ;;  %s64_s12 = sadd.s32 1, %s3359_s15 }
  0x51   : > { %s61_s11 = ssub.s32 %s3363_s16, %s3539_s30  ;;  %p71_p1 = scmp.ne.s32.totalorder %s3359_s15, %s3355_s14 }
  0x52   : > { %p62_p12 = scmp.eq.s32.totalorder %s61_s11, 0  ;;  %p72_p2 = scmp.eq.s32.totalorder %s3363_s16, 0 }
  0x53   : > { %p3976_p6 = scmp.eq.s32.totalorder %s3453_s17, 3  ;;  %p2989_p11 = scmp.lt.s32.totalorder %s3363_s16, 4 }
  0x54   : > { %s3548_s22 = scalar_select %p62_p12, %s3359_s15, %s64_s12  }
  0x55   : > { %p73_p4 = por %p72_p2, %p71_p1  ;;  %p3552_p8 = por %p3976_p6, %p71_p1 }
  0x56   : > { %s355_s24 = sand.u32 1, %s3359_s15   ;;  %s2564_s26 = sshll.u32 %s3363_s16, 8 }
  0x57   : > { %s2366_s23 = sshll.u32 %s355_s24, 4  ;;  %s3978_s1 = sld [smem:[#allocation19_spill]] }
  0x58   : > { %s359_s29 = scalar_lea.vmem [#allocation2], %s2366_s23  ;;  %p3566_p10 = pnand %p2989_p11, %p73_p4 }
  0x59   : > { %s366_s11 = sshll.u32 %s359_s29, 4  ;;  %s3570_s27 = scalar_lea.sflag [#allocation3], %s355_s24  ;;  %s3564_s11 = int_to_ptr.vmem [resolvable:$true] %s366_s11 }
  0x5a   : > { %p3205_p0 = pneg %p3566_p10 }
  0x5d   : > { %s3562_s20 = scalar_lea.hbm %s3978_s1, %s2564_s26  ;;  %s3208_s13 = scalar_lea.hbm %s3978_s1, 1024 }
  0x5e   : > { %s3203_s28 = scalar_lea.hbm %s3562_s20, 256  ;;  %p3209_p7 = scmp.lt.u32.totalorder %s3562_s20, %s3978_s1 }
  0x5f   : > { %p3204_p13 = scmp.ne.s32.totalorder %s3562_s20, %s3203_s28  ;;  %p3210_p9 = scmp.lt.u32.totalorder %s3208_s13, %s3203_s28 }
  0x60   : > { %p3212_p1 = scmp.lt.u32.totalorder %s3203_s28, %s3562_s20 }
  0x61   : > { %p3206_p3 = pnand %p3205_p0, %p3204_p13  ;;  %p3211_p12 = por %p3210_p9, %p3209_p7 }
  0x63   : > { %p3207_p5 = pneg %p3206_p3  ;;  %p3213_p2 = por %p3212_p1, %p3211_p12 }
  0x65   : > { %p3214_p4 = pnand %p3213_p2, %p3207_p5 }
  0x67   : > { %3217 = shalt.err (!%p3214_p4)
}
  0x68   : > { %s3218_s24 = scalar_lea.vmem %s3564_s11, 256  ;;  %s3371_s23 = smov [#allocation2]  }
  0x69   : > { %p3219_p6 = scmp.ne.s32.totalorder %s3564_s11, %s3218_s24  ;;  %s3223_s26 = sshll.u32 %s3371_s23, 4  ;;  %s3224_s26 = int_to_ptr.vmem [resolvable:$false] %s3223_s26 }
  0x6a   : > { %s3225_s18 = scalar_lea.vmem %s3224_s26, 512  ;;  %p3226_p3 = scmp.lt.s32.totalorder %s3564_s11, %s3224_s26 }
  0x6b   : > { %p3221_p11 = pnand %p3219_p6, %p3205_p0  ;;  %p3227_p7 = scmp.lt.s32.totalorder %s3225_s18, %s3218_s24 }
  0x6d   : > { %p3222_p13 = pneg %p3221_p11  ;;  %p3228_p9 = por %p3227_p7, %p3226_p3 }
  0x6f   : > { %p3229_p12 = pnand %p3228_p9, %p3222_p13 }
  0x71   : > { %3232 = shalt.err (!%p3229_p12)
}
  0x72   : > { %s3980_s28 = smov 4   ;;  %s3981_s13 = smov 64  }
  0x73   : > { %2976 = dma.hbm_to_vmem [thread:$0]  (!%p3566_p10), %s3562_s20, 256, %s3564_s11, %s3570_s27, %s3981_s13, %s3981_s13, %s3980_s28  }
  0x74   : > { %p3982_p0 = scmp.ne.s32.totalorder %s3972_s21, 0 }
  0x75   : > { %s3604_s29 = sand.u32 (!%p3982_p0), 1, %s3355_s14   ;;  %p3983_p5 = scmp.ne.s32.totalorder (!%p3982_p0), %s3969_s19, 0 }
  0x76   : > { %378 = sbr.rel (%p3982_p0) target bundleno = 1364 (0x554), region = 48  ;;  %s3607_s24 = sshll.u32 (!%p3982_p0), %s3604_s29, 4 }
  0x77   : > { %s381_s12 = scalar_lea.sflag (!%p3982_p0), [#allocation3], %s3604_s29  ;;  %s384_s23 = scalar_lea.vmem (!%p3982_p0), [#allocation2], %s3607_s24 }
  0x7d   : > { %3334 = dma.done.wait (%p3983_p5), %s381_s12, 256  }
  0x7e   : > { %3336 = vsyncadd (%p3983_p5), %s381_s12, 4294967040  ;;  %p3984_p10 = scmp.eq.s32.totalorder %s3453_s17, 0 }
  0x80   : > { %3338 = dma.done.wait (%p3984_p10), [#allocation6], 8192   ;;  %p3985_p1 = pmov %p3984_p10 }
  0x81   : > { %v3033_v0 = vld [vmem:[#allocation5 + $0x40] sm:$0xff]   ;;  %v3037_v4 = vld [vmem:[#allocation5 + $0x48] sm:$0xff]   ;;  %v3041_v8 = vld [vmem:[#allocation5 + $0x50] sm:$0xff]   ;;  %s2376_s19 = sshll.u32 %s3453_s17, 2  ;;  %s3986_s0 = sld [smem:[#allocation18_spill]]  ;;  %vm1795_vm0 = vcmask 523264  }
  0x82   : > { %3340 = vsyncadd (%p3985_p1), [#allocation6], 4294959104  ;;  %v3034_v1 = vld [vmem:[#allocation5] sm:$0xff]   ;;  %2618 = vmatprep.subr.bf16.mxu0 %v3033_v0  ;;  %v3038_v5 = vld [vmem:[#allocation5 + $0x8] sm:$0xff]   ;;  %p451_p2 = scmp.lt.s32.totalorder %s2376_s19, 15  ;;  %s3647_s28 = scalar_lea.vmem [#allocation9], %s3607_s24 }
  0x83   : > { %v3035_v2 = vld [vmem:[#allocation5 + $0xc0] sm:$0xff]   ;;  %2619 = vmatpush3.bf16.msra.mxu0 %v3034_v1  ;;  %v3039_v6 = vld [vmem:[#allocation5 + $0xc8] sm:$0xff]   ;;  %v3042_v9 = vld [vmem:[#allocation5 + $0x10] sm:$0xff]   ;;  %s2155_s13 = sshll.u32 %s3647_s28, 4  ;;  %s3820_s27 = sshll.u32 %s3453_s17, 8  ;;  %s3812_s13 = int_to_ptr.vmem [resolvable:$true] %s2155_s13 }
  0x84   : > { %v3036_v3 = vld [vmem:[#allocation5 + $0x80] sm:$0xff]   ;;  %2646 = vmatprep.subr.bf16.mxu1 %v3035_v2  ;;  %2620 = vmatprep.subr.bf16.mxu0 %v3037_v4  ;;  %v3040_v7 = vld [vmem:[#allocation5 + $0x88] sm:$0xff]   ;;  %v3043_v10 = vld [vmem:[#allocation5 + $0xd0] sm:$0xff]   ;;  %s3996_s19 = smov (!%p451_p2, %s2376_s19), 15  ;;  %s3826_s26 = scalar_lea.hbm %s3954_s9, %s3820_s27 }
  0x85   : > { %2647 = vmatpush3.bf16.msra.mxu1 %v3036_v3  ;;  %v3044_v11 = vld [vmem:[#allocation5 + $0x90] sm:$0xff]   ;;  %v3045_v12 = vld [vmem:[#allocation5 + $0x58] sm:$0xff]   ;;  %v3049_v16 = vld [vmem:[#allocation5 + $0x60] sm:$0xff]   ;;  %s2565_s21 = sshll.u32 %s3996_s19, 4 }
  0x86   : > { %2648 = vmatprep.subr.bf16.mxu1 %v3039_v6  ;;  %v3046_v13 = vld [vmem:[#allocation5 + $0x18] sm:$0xff]   ;;  %v3050_v17 = vld [vmem:[#allocation5 + $0x20] sm:$0xff]   ;;  %v3053_v20 = vld [vmem:[#allocation5 + $0x68] sm:$0xff]  }
  0x87   : > { %2621 = vmatpush3.bf16.msra.mxu0 %v3038_v5  ;;  %v3047_v14 = vld [vmem:[#allocation5 + $0xd8] sm:$0xff]   ;;  %v3051_v18 = vld [vmem:[#allocation5 + $0xe0] sm:$0xff]   ;;  %v3054_v21 = vld [vmem:[#allocation5 + $0x28] sm:$0xff]   ;;  %s3626_s11 = scalar_lea.vmem %s3986_s0, %s2565_s21  ;;  %s3754_s0 = scalar_lea.vmem [#allocation8], %s3607_s24 }
  0x88   : > { %2622 = vmatprep.subr.bf16.mxu0 %v3041_v8  ;;  %v3048_v15 = vld [vmem:[#allocation5 + $0x98] sm:$0xff]   ;;  %v3052_v19 = vld [vmem:[#allocation5 + $0xa0] sm:$0xff]   ;;  %v3055_v22 = vld [vmem:[#allocation5 + $0xe8] sm:$0xff]   ;;  %s2139_s12 = sshll.u32 %s3754_s0, 4  ;;  %s2116_s21 = sand.u32 1, %s3453_s17   ;;  %s3816_s12 = int_to_ptr.vmem [resolvable:$true] %s2139_s12 }
  0x89   : > { %2649 = vmatpush3.bf16.msra.mxu1 %v3040_v7  ;;  %v3056_v23 = vld [vmem:[#allocation5 + $0xa8] sm:$0xff]   ;;  %v3057_v24 = vld [vmem:[#allocation5 + $0x70] sm:$0xff]   ;;  %v3061_v28 = vld [vmem:[#allocation5 + $0x78] sm:$0xff]  }
  0x8a   : > { %2650 = vmatprep.subr.bf16.mxu1 %v3043_v10  ;;  %v3058_v25 = vld [vmem:[#allocation5 + $0x30] sm:$0xff]   ;;  %v3062_v29 = vld [vmem:[#allocation5 + $0x38] sm:$0xff]   ;;  %v2381_v2 = vld [vmem:[%s3951_s6] ss:$0 sm:$0xff] }
  0x8b   : > { %2623 = vmatpush3.bf16.msra.mxu0 %v3042_v9  ;;  %v3059_v26 = vld [vmem:[#allocation5 + $0xf0] sm:$0xff]   ;;  %v3063_v30 = vld [vmem:[#allocation5 + $0xf8] sm:$0xff]  }
  0x8c   : > { %2624 = vmatprep.subr.bf16.mxu0 %v3045_v12  ;;  %v3060_v27 = vld [vmem:[#allocation5 + $0xb0] sm:$0xff]   ;;  %v3067_v33 = vld [vmem:[#allocation5 + $0xb8] sm:$0xff]  }
  0x8d   : > { %2651 = vmatpush3.bf16.msra.mxu1 %v3044_v11  ;;  %v3064_v31 = vld [vmem:[%s3626_s11] ss:$16 sps:$4 sm:$0xff]   ;;  %v3066_v32 = vld [vmem:[%s3626_s11 + $0x4] ss:$16 sps:$4 sm:$0xff]   ;;  %v3069_v35 = vld [vmem:[%s3626_s11 + $0x8] ss:$16 sps:$4 sm:$0xff]  }
  0x8e   : > { %2652 = vmatprep.subr.bf16.mxu1 %v3047_v14  ;;  %880 = vmatprep.mubr.bf16.mxu0 %v3066_v32  ;;  %v3068_v34 = vld [vmem:[#allocation7] ss:$16 sps:$4 sm:$0xff]   ;;  %v3071_v36 = vld [vmem:[%s3626_s11 + $0xc] ss:$16 sps:$4 sm:$0xff]   ;;  %v3076_v39 = vld [vmem:[%s3626_s11 + $0x24] ss:$16 sps:$4 sm:$0xff]  }
  0x8f   : > { %2625 = vmatpush3.bf16.msra.mxu0 %v3046_v13  ;;  %v3072_v37 = vld [vmem:[#allocation7 + $0x20] ss:$16 sps:$4 sm:$0xff]   ;;  %929 = vmatprep.mubr.bf16.mxu1 %v3071_v36  ;;  %v3080_v42 = vld [vmem:[%s3626_s11 + $0x2c] ss:$16 sps:$4 sm:$0xff]   ;;  %v3082_v43 = vld [vmem:[%s3626_s11 + $0x28] ss:$16 sps:$4 sm:$0xff]  }
  0x90   : > { %2626 = vmatprep.subr.bf16.mxu0 %v3049_v16  ;;  %v3073_v38 = vld [vmem:[#allocation7 + $0x40] ss:$16 sps:$4 sm:$0xff]   ;;  %v3086_v49 = vld [vmem:[%s384_s23 + $0x8] sm:$0xff]   ;;  %v3640_v58 = vld [vmem:[#allocation7 + $0x4] ss:$16 sps:$4 sm:$0xff]  }
  0x91   : > { %2653 = vmatpush3.bf16.msra.mxu1 %v3048_v15  ;;  %v3074_v40 = vld [vmem:[#allocation7 + $0x60] ss:$16 sps:$4 sm:$0xff]   ;;  %v3087_v50 = vld [vmem:[#allocation7 + $0x8] ss:$16 sps:$4 sm:$0xff]   ;;  %v3111_v59 = vld [vmem:[#allocation7 + $0xc] ss:$16 sps:$4 sm:$0xff]  }
  0x92   : > { %2654 = vmatprep.subr.bf16.mxu1 %v3051_v18  ;;  %v3079_v41 = vld [vmem:[%s3626_s11 + $0x20] ss:$16 sps:$4 sm:$0xff]   ;;  %v3088_v51 = vld [vmem:[#allocation7 + $0x28] ss:$16 sps:$4 sm:$0xff]   ;;  %v3112_v60 = vld [vmem:[#allocation7 + $0x2c] ss:$16 sps:$4 sm:$0xff]  }
  0x93   : > { %2627 = vmatpush3.bf16.msra.mxu0 %v3050_v17  ;;  %v3075_v44 = vld [vmem:[#allocation7 + $0x80] ss:$16 sps:$4 sm:$0xff]   ;;  %v3089_v52 = vld [vmem:[#allocation7 + $0x48] ss:$16 sps:$4 sm:$0xff]   ;;  %v3113_v61 = vld [vmem:[#allocation7 + $0x4c] ss:$16 sps:$4 sm:$0xff]  }
  0x94   : > { %2628 = vmatprep.subr.bf16.mxu0 %v3053_v20  ;;  %v3085_v45 = vld [vmem:[%s384_s23] sm:$0xff]   ;;  %v3090_v53 = vld [vmem:[#allocation7 + $0x68] ss:$16 sps:$4 sm:$0xff]   ;;  %v3114_v62 = vld [vmem:[#allocation7 + $0x6c] ss:$16 sps:$4 sm:$0xff]   ;;  %s3662_s23 = scalar_lea.vmem [#allocation11], %s3607_s24 }
  0x95   : > { %2655 = vmatpush3.bf16.msra.mxu1 %v3052_v19  ;;  %v3078_v46 = vld [vmem:[#allocation7 + $0xa0] ss:$16 sps:$4 sm:$0xff]   ;;  %v3091_v54 = vld [vmem:[#allocation7 + $0x88] ss:$16 sps:$4 sm:$0xff]   ;;  %v3115_v63 = vld [vmem:[#allocation7 + $0x8c] ss:$16 sps:$4 sm:$0xff]  }
  0x96   : > { %2656 = vmatprep.subr.bf16.mxu1 %v3055_v22  ;;  %v3083_v47 = vld [vmem:[#allocation7 + $0xc0] ss:$16 sps:$4 sm:$0xff]   ;;  %v3092_v55 = vld [vmem:[#allocation7 + $0xa8] ss:$16 sps:$4 sm:$0xff]   ;;  %v3116_v0 = vld [vmem:[#allocation7 + $0xac] ss:$16 sps:$4 sm:$0xff]  }
  0x97   : > { %2629 = vmatpush3.bf16.msra.mxu0 %v3054_v21  ;;  %v3084_v48 = vld [vmem:[#allocation7 + $0xe0] ss:$16 sps:$4 sm:$0xff]   ;;  %v3093_v56 = vld [vmem:[#allocation7 + $0xc8] ss:$16 sps:$4 sm:$0xff]   ;;  %s2171_s24 = sshll.u32 %s3662_s23, 4  ;;  %s3814_s24 = int_to_ptr.vmem [resolvable:$true] %s2171_s24 }
  0x98   : > { %2630 = vmatprep.subr.bf16.mxu0 %v3057_v24  ;;  %v3094_v57 = vld [vmem:[#allocation7 + $0xe8] ss:$16 sps:$4 sm:$0xff]  }
  0x99   : > { %2657 = vmatpush3.bf16.msra.mxu1 %v3056_v23 }
  0x9a   : > { %2658 = vmatprep.subr.bf16.mxu1 %v3059_v26 }
  0x9b   : > { %2631 = vmatpush3.bf16.msra.mxu0 %v3058_v25 }
  0x9c   : > { %2632 = vmatprep.subr.bf16.mxu0 %v3061_v28 }
  0x9d   : > { %2659 = vmatpush3.bf16.msra.mxu1 %v3060_v27 }
  0x9e   : > { %2660 = vmatprep.subr.bf16.mxu1 %v3063_v30 }
  0x9f   : > { %2633 = vmatpush3.bf16.msra.mxu0 %v3062_v29 }
  0xa0   : > { %2762 = vmatprep.subr.bf16.mxu0 %v3068_v34 }
  0xa1   : > { %2661 = vmatpush3.bf16.msra.mxu1 %v3067_v33 }
  0xa2   : > { %881 = vmatmul.mubr.bf16.vlgmr.msra.gmra.mrb[0].mxu0 %v3064_v31  ;;  %2782 = vmatprep.subr.bf16.mxu1 %v3087_v50 }
  0xa3   : > { %2763 = vmatpush3.bf16.msra.mxu0 %v3068_v34  ;;  %888 = vmatprep.mubr.bf16.mxu0 %v3076_v39 }
  0xa4   : > { %930 = vmatmul.mubr.bf16.vlgmr.msra.gmra.mrb[0].mxu1 %v3069_v35  ;;  %2764 = vmatprep.subr.bf16.mxu0 %v3072_v37 }
  0xa5   : > { %937 = vmatprep.mubr.bf16.mxu1 %v3080_v42  ;;  %2783 = vmatpush3.bf16.msra.mxu1 %v3087_v50 }
  0xa6   : > { %2784 = vmatprep.subr.bf16.mxu1 %v3088_v51 }
  0xa7   : > { %2765 = vmatpush3.bf16.msra.mxu0 %v3072_v37 }
  0xa8   : > { %2766 = vmatprep.subr.bf16.mxu0 %v3073_v38 }
  0xa9   : > { %2785 = vmatpush3.bf16.msra.mxu1 %v3088_v51 }
  0xaa   : > { %889 = vmatmul.mubr.bf16.gmra.mrb[4].mxu0 %v3079_v41  ;;  %2786 = vmatprep.subr.bf16.mxu1 %v3089_v52 }
  0xab   : > { %2767 = vmatpush3.bf16.msra.mxu0 %v3073_v38  ;;  %2778 = vmatprep.mubr.bf16.mxu0 %v3085_v45 }
  0xac   : > { %2768 = vmatprep.subr.bf16.mxu0 %v3074_v40  ;;  %938 = vmatmul.mubr.bf16.gmra.mrb[4].mxu1 %v3082_v43 }
  0xad   : > { %2787 = vmatpush3.bf16.msra.mxu1 %v3089_v52 }
  0xae   : > { %2788 = vmatprep.subr.bf16.mxu1 %v3090_v53 }
  0xaf   : > { %2769 = vmatpush3.bf16.msra.mxu0 %v3074_v40  ;;  %v2422_v40 = vld [vmem:[%s3951_s6 + $0x1] ss:$0 sm:$0xff] }
  0xb0   : > { %2770 = vmatprep.subr.bf16.mxu0 %v3075_v44 }
  0xb1   : > { %2789 = vmatpush3.bf16.msra.mxu1 %v3090_v53 }
  0xb2   : > { %2790 = vmatprep.subr.bf16.mxu1 %v3091_v54 }
  0xb3   : > { %2771 = vmatpush3.bf16.msra.mxu0 %v3075_v44 }
  0xb4   : > { %2772 = vmatprep.subr.bf16.mxu0 %v3078_v46 }
  0xb5   : > { %2791 = vmatpush3.bf16.msra.mxu1 %v3091_v54 }
  0xb6   : > { %2792 = vmatprep.subr.bf16.mxu1 %v3092_v55 }
  0xb7   : > { %2773 = vmatpush3.bf16.msra.mxu0 %v3078_v46 }
  0xb8   : > { %2774 = vmatprep.subr.bf16.mxu0 %v3083_v47 }
  0xb9   : > { %2793 = vmatpush3.bf16.msra.mxu1 %v3092_v55  ;;  %v3096_v55 = vld [vmem:[#allocation7 + $0x24] ss:$16 sps:$4 sm:$0xff]  }
  0xba   : > { %2794 = vmatprep.subr.bf16.mxu1 %v3093_v56 }
  0xbb   : > { %2775 = vmatpush3.bf16.msra.mxu0 %v3083_v47 }
  0xbc   : > { %2776 = vmatprep.subr.bf16.mxu0 %v3084_v48 }
  0xbd   : > { %2795 = vmatpush3.bf16.msra.mxu1 %v3093_v56  ;;  %v3097_v56 = vld [vmem:[#allocation7 + $0x44] ss:$16 sps:$4 sm:$0xff]  }
  0xbe   : > { %2796 = vmatprep.subr.bf16.mxu1 %v3094_v57 }
  0xbf   : > { %2777 = vmatpush3.bf16.msra.mxu0 %v3084_v48 }
  0xc0   : > { %2822 = vmatprep.subr.bf16.mxu0 %v3111_v59 }
  0xc1   : > { %2797 = vmatpush3.bf16.msra.mxu1 %v3094_v57  ;;  %v3098_v57 = vld [vmem:[#allocation7 + $0x64] ss:$16 sps:$4 sm:$0xff]  }
  0xc2   : > { %2779 = vmatmul.mubr.bf16.vlgmr.msra.gmra.mrb[8].mxu0 %v3086_v49  ;;  %2802 = vmatprep.subr.bf16.mxu1 %v3640_v58 }
  0xc3   : > { %2823 = vmatpush3.bf16.msra.mxu0 %v3111_v59  ;;  %v3099_v59 = vld [vmem:[#allocation7 + $0x84] ss:$16 sps:$4 sm:$0xff]  }
  0xc4   : > { %2824 = vmatprep.subr.bf16.mxu0 %v3112_v60 }
  0xc7   : > { %2825 = vmatpush3.bf16.msra.mxu0 %v3112_v60  ;;  %v3100_v60 = vld [vmem:[#allocation7 + $0xa4] ss:$16 sps:$4 sm:$0xff]  }
  0xc8   : > { %2826 = vmatprep.subr.bf16.mxu0 %v3113_v61 }
  0xcb   : > { %2827 = vmatpush3.bf16.msra.mxu0 %v3113_v61  ;;  %v3101_v61 = vld [vmem:[#allocation7 + $0xc4] ss:$16 sps:$4 sm:$0xff]  }
  0xcc   : > { %2828 = vmatprep.subr.bf16.mxu0 %v3114_v62 }
  0xcf   : > { %2829 = vmatpush3.bf16.msra.mxu0 %v3114_v62  ;;  %v3102_v62 = vld [vmem:[#allocation7 + $0xe4] ss:$16 sps:$4 sm:$0xff]  }
  0xd0   : > { %2830 = vmatprep.subr.bf16.mxu0 %v3115_v63 }
  0xd3   : > { %2831 = vmatpush3.bf16.msra.mxu0 %v3115_v63  ;;  %v3104_v63 = vld [vmem:[%s3949_s4 + $0x48] sm:$0xff]  }
  0xd4   : > { %2832 = vmatprep.subr.bf16.mxu0 %v3116_v0 }
  0xd7   : > { %2833 = vmatpush3.bf16.msra.mxu0 %v3116_v0  ;;  %v3105_v0 = vld [vmem:[%s3949_s4 + $0x50] sm:$0xff]  }
 0x175   : > { %v2634_v1 = vpop.f32.mrb[0].mxu0 }
 0x176   : > { %v2635_v3 = vpop.f32.mrb[1].mxu0 }
 0x177   : > { %v2636_v4 = vadd.f32 %v2635_v3, %v2634_v1  ;;  %v2637_v5 = vpop.f32.mrb[2].mxu0  ;;  %v2662_v6 = vpop.f32.mrb[0].mxu1  ;;  %v3106_v1 = vld [vmem:[%s3949_s4 + $0x58] sm:$0xff]   ;;  %v3108_v3 = vld [vmem:[%s3949_s4 + $0x68] sm:$0xff]  }
 0x178   : > { %v2638_v7 = vpop.f32.mrb[3].mxu0  ;;  %v2663_v10 = vpop.f32.mrb[1].mxu1 }
 0x179   : > { %v883_v8 = vadd.f32 %v2636_v4, %v2381_v2  ;;  %v2639_v9 = vadd.f32 %v2638_v7, %v2637_v5  ;;  %v2664_v11 = vadd.f32 %v2663_v10, %v2662_v6  ;;  %v2665_v12 = vpop.f32.mrb[2].mxu1  ;;  %v3109_v4 = vld [vmem:[%s3949_s4 + $0x70] sm:$0xff]   ;;  %v3110_v5 = vld [vmem:[%s3949_s4 + $0x78] sm:$0xff]  }
 0x17a   : > { %v2666_v14 = vpop.f32.mrb[3].mxu1  ;;  %v3117_v6 = vld [vmem:[#allocation7 + $0xcc] ss:$16 sps:$4 sm:$0xff]   ;;  %v3121_v10 = vld [vmem:[%s3950_s5 + $0x30] sm:$0xff]  }
 0x17b   : > { %v886_v13 = vadd.f32 %v2639_v9, %v2381_v2  ;;  %v932_v15 = vadd.f32 %v2664_v11, %v883_v8  ;;  %v2667_v16 = vadd.f32 %v2666_v14, %v2665_v12  ;;  %2834 = vmatprep.subr.bf16.mxu0 %v3117_v6  ;;  %v3118_v7 = vld [vmem:[#allocation7 + $0xec] ss:$16 sps:$4 sm:$0xff]   ;;  %v3119_v8 = vld [vmem:[%s3950_s5 + $0x20] sm:$0xff]  }
 0x17c   : > { %2835 = vmatpush3.bf16.msra.mxu0 %v3117_v6  ;;  %v3120_v9 = vld [vmem:[%s3950_s5 + $0x28] sm:$0xff]   ;;  %v3122_v11 = vld [vmem:[%s3950_s5 + $0x38] sm:$0xff]   ;;  %v3123_v12 = vld [vmem:[%s3949_s4] sm:$0xff]  }
 0x17d   : > { %v2640_v17 = vpop.f32.mrb[4].mxu0  ;;  %v935_v18 = vadd.f32 %v2667_v16, %v886_v13  ;;  %v946_v22 = vmax.f32 %v932_v15, 0.0  ;;  %2836 = vmatprep.subr.bf16.mxu0 %v3118_v7  ;;  %v2449_v13 = vld [vmem:[%s3951_s6 + $0x2] ss:$0 sm:$0xff]  ;;  %v3137_v6 = vld [vmem:[%s3949_s4 + $0xb0] sm:$0xff]  }
 0x17e   : > { %v2641_v19 = vpop.f32.mrb[5].mxu0 }
 0x17f   : > { %v2642_v20 = vadd.f32 %v2641_v19, %v2640_v17  ;;  %v2643_v21 = vpop.f32.mrb[6].mxu0  ;;  %v947_v23 = vmax.f32 %v935_v18, 0.0  ;;  %v2668_v24 = vpop.f32.mrb[4].mxu1 }
 0x180   : > { %v2644_v25 = vpop.f32.mrb[7].mxu0  ;;  %v2669_v28 = vpop.f32.mrb[5].mxu1  ;;  %2837 = vmatpush3.bf16.msra.mxu0 %v3118_v7  ;;  %v3138_v7 = vld [vmem:[%s3949_s4 + $0xb8] sm:$0xff]  }
 0x181   : > { %v891_v26 = vadd.f32 %v2642_v20, %v2381_v2  ;;  %v2645_v27 = vadd.f32 %v2644_v25, %v2643_v21  ;;  %v2670_v29 = vadd.f32 %v2669_v28, %v2668_v24  ;;  %v2671_v30 = vpop.f32.mrb[6].mxu1  ;;  %v1071_v31 = vpack.c.bf16 %v947_v23, %v946_v22  ;;  %2842 = vmatprep.subr.bf16.mxu0 %v3123_v12  ;;  %v3124_v28 = vld [vmem:[%s3949_s4 + $0x8] sm:$0xff]  }
 0x182   : > { %v2672_v33 = vpop.f32.mrb[7].mxu1 }
 0x183   : > { %v894_v32 = vadd.f32 %v2645_v27, %v2381_v2  ;;  %v940_v34 = vadd.f32 %v2670_v29, %v891_v26  ;;  %v2673_v35 = vadd.f32 %v2672_v33, %v2671_v30  ;;  %2599 = vst [vmem:[%s3647_s28] sm:$0xff] %v1071_v31   ;;  %v3107_v2 = vld [vmem:[%s3949_s4 + $0x60] sm:$0xff]   ;;  %v3125_v29 = vld [vmem:[%s3949_s4 + $0x10] sm:$0xff]   ;;  %v3126_v30 = vld [vmem:[%s3949_s4 + $0x18] sm:$0xff]  }
 0x184   : > { %v2484_v33 = vld [vmem:[%s3951_s6 + $0x5] ss:$0 sm:$0xff] }
 0x185   : > { %v948_v36 = vmax.f32 %v940_v34, 0.0  ;;  %v943_v37 = vadd.f32 %v2673_v35, %v894_v32  ;;  %v3128_v32 = vld [vmem:[%s3949_s4 + $0x28] sm:$0xff]  }
 0x187   : > { %v949_v38 = vmax.f32 %v943_v37, 0.0 }
 0x189   : > { %v3650_v39 = vpack.c.bf16 %v949_v38, %v948_v36 }
 0x18b   : > { %2616 = vst [vmem:[%s3647_s28 + $0x8] sm:$0xff] %v3650_v39   ;;  %s3828_s28 = scalar_lea.sflag [#allocation10], %s2116_s21 }
 0x195   : > { %v2780_v41 = vpop.f32.mrb[8].mxu0 }
 0x196   : > { %v1061_v42 = vadd.f32 %v2780_v41, %v2422_v40  ;;  %v1052_v43 = vpop.f32.mrb[9].mxu0 }
 0x197   : > { %v1053_v44 = vadd.f32 %v2422_v40, %v1052_v43  ;;  %v2781_v45 = vpop.f32.mrb[10].mxu0 }
 0x198   : > { %v1064_v46 = vadd.f32 %v2781_v45, %v2422_v40  ;;  %v1055_v47 = vpop.f32.mrb[11].mxu0  ;;  %v1069_v49 = vmax.f32 %v1061_v42, 0.0 }
 0x199   : > { %v1056_v48 = vadd.f32 %v2422_v40, %v1055_v47  ;;  %v1067_v51 = vmax.f32 %v1053_v44, 0.0 }
 0x19a   : > { %v1070_v50 = vmax.f32 %v1064_v46, 0.0 }
 0x19b   : > { %v1068_v52 = vmax.f32 %v1056_v48, 0.0  ;;  %v3129_v48 = vld [vmem:[%s3949_s4 + $0x30] sm:$0xff]  }
 0x19c   : > { %v3657_v53 = vpack.c.bf16 %v1070_v50, %v1069_v49  ;;  %v3130_v49 = vld [vmem:[%s3949_s4 + $0x38] sm:$0xff]   ;;  %v3131_v50 = vld [vmem:[%s3949_s4 + $0x80] sm:$0xff]  }
 0x19d   : > { %v3659_v54 = vpack.c.bf16 %v1068_v52, %v1067_v51  ;;  %v3139_v51 = vld [vmem:[%s3950_s5] sm:$0xff]   ;;  %v3140_v52 = vld [vmem:[%s3950_s5 + $0x8] sm:$0xff]  }
 0x19e   : > { %2617 = vst [vmem:[%s3662_s23 + $0x8] sm:$0xff] %v3657_v53  }
 0x19f   : > { %2609 = vst [vmem:[%s3662_s23] sm:$0xff] %v3659_v54   ;;  %2798 = vmatprep.mubr.bf16.mxu1 %v3659_v54  ;;  %s3233_s23 = scalar_lea.vmem %s3812_s13, 256 }
 0x1a0   : > { %2799 = vmatmul.mubr.bf16.vlgmr.msra.gmra.mrb[8].mxu1 %v3657_v53  ;;  %p3234_p4 = scmp.ne.s32.totalorder %s3812_s13, %s3233_s23 }
 0x1a1   : > { %2803 = vmatpush3.bf16.msra.mxu1 %v3640_v58  ;;  %2818 = vmatprep.mubr.bf16.mxu1 %v1071_v31  ;;  %v3103_v58 = vld [vmem:[%s3949_s4 + $0x40] sm:$0xff]  }
 0x1a2   : > { %2804 = vmatprep.subr.bf16.mxu1 %v3096_v55  ;;  %p3235_p6 = pnand %p3234_p4, %p3552_p8 }
 0x1a4   : > { %p3236_p11 = pneg %p3235_p6 }
 0x1a5   : > { %2805 = vmatpush3.bf16.msra.mxu1 %v3096_v55 }
 0x1a6   : > { %2806 = vmatprep.subr.bf16.mxu1 %v3097_v56 }
 0x1a9   : > { %2807 = vmatpush3.bf16.msra.mxu1 %v3097_v56  ;;  %v2450_v56 = vld [vmem:[%s3951_s6 + $0x3] ss:$0 sm:$0xff] }
 0x1aa   : > { %2808 = vmatprep.subr.bf16.mxu1 %v3098_v57 }
 0x1ad   : > { %2809 = vmatpush3.bf16.msra.mxu1 %v3098_v57 }
 0x1ae   : > { %2810 = vmatprep.subr.bf16.mxu1 %v3099_v59 }
 0x1b1   : > { %2811 = vmatpush3.bf16.msra.mxu1 %v3099_v59 }
 0x1b2   : > { %2812 = vmatprep.subr.bf16.mxu1 %v3100_v60 }
 0x1b5   : > { %2813 = vmatpush3.bf16.msra.mxu1 %v3100_v60 }
 0x1b6   : > { %2814 = vmatprep.subr.bf16.mxu1 %v3101_v61 }
 0x1b9   : > { %2815 = vmatpush3.bf16.msra.mxu1 %v3101_v61 }
 0x1ba   : > { %2816 = vmatprep.subr.bf16.mxu1 %v3102_v62 }
 0x1bd   : > { %2817 = vmatpush3.bf16.msra.mxu1 %v3102_v62 }
 0x1be   : > { %2862 = vmatprep.subr.bf16.mxu1 %v3103_v58 }
 0x1c0   : > { %2819 = vmatmul.mubr.bf16.vlgmr.msra.gmra.mrb[8].mxu1 %v3650_v39 }
 0x1c1   : > { %2863 = vmatpush3.bf16.msra.mxu1 %v3103_v58  ;;  %2878 = vmatprep.mubr.bf16.mxu1 %v1071_v31  ;;  %v3127_v31 = vld [vmem:[%s3949_s4 + $0x20] sm:$0xff]  }
 0x1c2   : > { %2864 = vmatprep.subr.bf16.mxu1 %v3104_v63 }
 0x1c5   : > { %2865 = vmatpush3.bf16.msra.mxu1 %v3104_v63 }
 0x1c6   : > { %2866 = vmatprep.subr.bf16.mxu1 %v3105_v0 }
 0x1c9   : > { %2867 = vmatpush3.bf16.msra.mxu1 %v3105_v0 }
 0x1ca   : > { %2868 = vmatprep.subr.bf16.mxu1 %v3106_v1 }
 0x1cd   : > { %2869 = vmatpush3.bf16.msra.mxu1 %v3106_v1 }
 0x1ce   : > { %2870 = vmatprep.subr.bf16.mxu1 %v3107_v2 }
 0x1d1   : > { %2871 = vmatpush3.bf16.msra.mxu1 %v3107_v2  ;;  %v3132_v2 = vld [vmem:[%s3949_s4 + $0x88] sm:$0xff]  }
 0x1d2   : > { %2872 = vmatprep.subr.bf16.mxu1 %v3108_v3 }
 0x1d5   : > { %2873 = vmatpush3.bf16.msra.mxu1 %v3108_v3  ;;  %v3133_v3 = vld [vmem:[%s3949_s4 + $0x90] sm:$0xff]  }
 0x1d6   : > { %2874 = vmatprep.subr.bf16.mxu1 %v3109_v4 }
 0x1d9   : > { %2875 = vmatpush3.bf16.msra.mxu1 %v3109_v4  ;;  %v3134_v4 = vld [vmem:[%s3949_s4 + $0x98] sm:$0xff]  }
 0x1da   : > { %2876 = vmatprep.subr.bf16.mxu1 %v3110_v5 }
 0x1dd   : > { %2877 = vmatpush3.bf16.msra.mxu1 %v3110_v5  ;;  %v3135_v5 = vld [vmem:[%s3949_s4 + $0xa0] sm:$0xff]  }
 0x1de   : > { %2902 = vmatprep.subr.bf16.mxu1 %v3119_v8 }
 0x1e0   : > { %2879 = vmatmul.mubr.bf16.vlgmr.msra.gmra.mrb[12].mxu1 %v3650_v39 }
 0x1e1   : > { %2903 = vmatpush3.bf16.msra.mxu1 %v3119_v8  ;;  %v3141_v8 = vld [vmem:[%s3950_s5 + $0x10] sm:$0xff]  }
 0x1e2   : > { %2904 = vmatprep.subr.bf16.mxu1 %v3120_v9 }
 0x1e5   : > { %2905 = vmatpush3.bf16.msra.mxu1 %v3120_v9  ;;  %v3142_v9 = vld [vmem:[%s3950_s5 + $0x18] sm:$0xff]  }
 0x1e6   : > { %2906 = vmatprep.subr.bf16.mxu1 %v3121_v10 }
 0x1e9   : > { %2907 = vmatpush3.bf16.msra.mxu1 %v3121_v10  ;;  %v3143_v10 = vld [vmem:[%s3950_s5 + $0x40] sm:$0xff]  }
 0x1ea   : > { %2908 = vmatprep.subr.bf16.mxu1 %v3122_v11 }
 0x1ed   : > { %2909 = vmatpush3.bf16.msra.mxu1 %v3122_v11 }
 0x1ee   : > { %2914 = vmatprep.subr.bf16.mxu1 %v3139_v51 }
 0x293   : > { %v2820_v14 = vpop.f32.mrb[8].mxu1 }
 0x294   : > { %v1275_v15 = vadd.f32 %v2820_v14, %v2449_v13  ;;  %v1254_v16 = vpop.f32.mrb[9].mxu1 }
 0x295   : > { %v1273_v17 = vadd.f32 %v2449_v13, %v1254_v16  ;;  %v2821_v18 = vpop.f32.mrb[10].mxu1 }
 0x296   : > { %v1276_v19 = vadd.f32 %v2821_v18, %v2449_v13  ;;  %v1257_v20 = vpop.f32.mrb[11].mxu1  ;;  %v1279_v22 = vmax.f32 %v1275_v15, 0.0 }
 0x297   : > { %v1274_v21 = vadd.f32 %v2449_v13, %v1257_v20  ;;  %v1277_v24 = vmax.f32 %v1273_v17, 0.0 }
 0x298   : > { %v1280_v23 = vmax.f32 %v1276_v19, 0.0 }
 0x299   : > { %v1278_v25 = vmax.f32 %v1274_v21, 0.0 }
 0x29a   : > { %v1282_v26 = vpack.c.bf16 %v1280_v23, %v1279_v22 }
 0x29b   : > { %v1281_v27 = vpack.c.bf16 %v1278_v25, %v1277_v24  ;;  %v3144_v25 = vld [vmem:[%s3950_s5 + $0x48] sm:$0xff]  }
 0x29d   : > { %2838 = vmatprep.mubr.bf16.mxu0 %v1281_v27  ;;  %v3146_v27 = vld [vmem:[%s3950_s5 + $0x58] sm:$0xff]  }
 0x29e   : > { %2839 = vmatmul.mubr.bf16.vlgmr.msra.gmra.mrb[12].mxu0 %v1282_v26  ;;  %v3145_v26 = vld [vmem:[%s3950_s5 + $0x50] sm:$0xff]  }
 0x29f   : > { %2843 = vmatpush3.bf16.msra.mxu0 %v3123_v12 }
 0x2a0   : > { %2844 = vmatprep.subr.bf16.mxu0 %v3124_v28 }
 0x2a3   : > { %2845 = vmatpush3.bf16.msra.mxu0 %v3124_v28  ;;  %v2509_v28 = vld [vmem:[%s3951_s6 + $0x6] ss:$0 sm:$0xff] }
 0x2a4   : > { %2846 = vmatprep.subr.bf16.mxu0 %v3125_v29 }
 0x2a7   : > { %2847 = vmatpush3.bf16.msra.mxu0 %v3125_v29 }
 0x2a8   : > { %2848 = vmatprep.subr.bf16.mxu0 %v3126_v30 }
 0x2ab   : > { %2849 = vmatpush3.bf16.msra.mxu0 %v3126_v30 }
 0x2ac   : > { %2850 = vmatprep.subr.bf16.mxu0 %v3127_v31 }
 0x2af   : > { %2851 = vmatpush3.bf16.msra.mxu0 %v3127_v31 }
 0x2b0   : > { %2852 = vmatprep.subr.bf16.mxu0 %v3128_v32 }
 0x2b3   : > { %v2880_v34 = vpop.f32.mrb[12].mxu1  ;;  %2853 = vmatpush3.bf16.msra.mxu0 %v3128_v32 }
 0x2b4   : > { %v1619_v35 = vadd.f32 %v2880_v34, %v2484_v33  ;;  %v1610_v36 = vpop.f32.mrb[13].mxu1  ;;  %2854 = vmatprep.subr.bf16.mxu0 %v3129_v48 }
 0x2b5   : > { %v1611_v37 = vadd.f32 %v2484_v33, %v1610_v36  ;;  %v2881_v38 = vpop.f32.mrb[14].mxu1 }
 0x2b6   : > { %v1622_v39 = vadd.f32 %v2881_v38, %v2484_v33  ;;  %v1613_v40 = vpop.f32.mrb[15].mxu1  ;;  %v1627_v42 = vmax.f32 %v1619_v35, 0.0 }
 0x2b7   : > { %v1614_v41 = vadd.f32 %v2484_v33, %v1613_v40  ;;  %v1625_v44 = vmax.f32 %v1611_v37, 0.0  ;;  %2855 = vmatpush3.bf16.msra.mxu0 %v3129_v48 }
 0x2b8   : > { %v1628_v43 = vmax.f32 %v1622_v39, 0.0  ;;  %2856 = vmatprep.subr.bf16.mxu0 %v3130_v49 }
 0x2b9   : > { %v1626_v45 = vmax.f32 %v1614_v41, 0.0 }
 0x2ba   : > { %v1762_v46 = vpack.c.bf16 %v1628_v43, %v1627_v42 }
 0x2bb   : > { %v1761_v47 = vpack.c.bf16 %v1626_v45, %v1625_v44  ;;  %2857 = vmatpush3.bf16.msra.mxu0 %v3130_v49 }
 0x2bc   : > { %2882 = vmatprep.subr.bf16.mxu0 %v3131_v50 }
 0x2bd   : > { %2910 = vmatprep.mubr.msk.bf16.mxu1 %vm1795_vm0, %v1761_v47 }
 0x2be   : > { %2911 = vmatmul.mubr.msk.bf16.vlgmr.msra.gmra.mrb[16].mxu1 %vm1795_vm0, %v1762_v46 }
 0x2bf   : > { %2915 = vmatpush3.bf16.msra.mxu1 %v3139_v51 }
 0x2c0   : > { %2916 = vmatprep.subr.bf16.mxu1 %v3140_v52 }
 0x2c3   : > { %2917 = vmatpush3.bf16.msra.mxu1 %v3140_v52 }
 0x2c4   : > { %2918 = vmatprep.subr.bf16.mxu1 %v3141_v8 }
 0x2c7   : > { %2919 = vmatpush3.bf16.msra.mxu1 %v3141_v8 }
 0x2c8   : > { %2920 = vmatprep.subr.bf16.mxu1 %v3142_v9 }
 0x2cb   : > { %2921 = vmatpush3.bf16.msra.mxu1 %v3142_v9 }
 0x2cc   : > { %2926 = vmatprep.subr.bf16.mxu1 %v3143_v10 }
 0x371   : > { %v2840_v55 = vpop.f32.mrb[12].mxu0 }
 0x372   : > { %v1369_v57 = vpop.f32.mrb[13].mxu0  ;;  %v1378_v60 = vadd.f32 %v2840_v55, %v2450_v56 }
 0x373   : > { %v2841_v59 = vpop.f32.mrb[14].mxu0  ;;  %v1370_v58 = vadd.f32 %v2450_v56, %v1369_v57 }
 0x374   : > { %v1381_v61 = vadd.f32 %v2841_v59, %v2450_v56  ;;  %v1372_v62 = vpop.f32.mrb[15].mxu0 }
 0x375   : > { %v1373_v63 = vadd.f32 %v2450_v56, %v1372_v62 }
 0x376   : > { %v1385_v0 = vpack.c.bf16 %v1381_v61, %v1378_v60 }
 0x377   : > { %v1384_v1 = vpack.c.bf16 %v1373_v63, %v1370_v58 }
 0x378   : > { %2615 = vst [vmem:[%s3754_s0 + $0x8] sm:$0xff] %v1385_v0  }
 0x379   : > { %2589 = vst [vmem:[%s3754_s0] sm:$0xff] %v1384_v1   ;;  %2858 = vmatprep.mubr.bf16.mxu0 %v1384_v1  ;;  %s3372_s0 = smov [#allocation9]  }
 0x37a   : > { %2859 = vmatmul.mubr.bf16.vlgmr.msra.gmra.mrb[16].mxu0 %v1385_v0  ;;  %s3237_s18 = sshll.u32 %s3372_s0, 4  ;;  %s3238_s18 = int_to_ptr.vmem [resolvable:$false] %s3237_s18 }
 0x37b   : > { %2883 = vmatpush3.bf16.msra.mxu0 %v3131_v50  ;;  %2898 = vmatprep.mubr.bf16.mxu0 %v3659_v54  ;;  %v3136_v54 = vld [vmem:[%s3949_s4 + $0xa8] sm:$0xff]   ;;  %s3239_s1 = scalar_lea.vmem %s3238_s18, 512  ;;  %p3240_p13 = scmp.lt.s32.totalorder %s3812_s13, %s3238_s18 }
 0x37c   : > { %2884 = vmatprep.subr.bf16.mxu0 %v3132_v2  ;;  %p3241_p3 = scmp.lt.s32.totalorder %s3239_s1, %s3233_s23 }
 0x37e   : > { %p3242_p7 = por %p3241_p3, %p3240_p13 }
 0x37f   : > { %2885 = vmatpush3.bf16.msra.mxu0 %v3132_v2 }
 0x380   : > { %2886 = vmatprep.subr.bf16.mxu0 %v3133_v3  ;;  %p3243_p9 = pnand %p3242_p7, %p3236_p11 }
 0x383   : > { %2887 = vmatpush3.bf16.msra.mxu0 %v3133_v3 }
 0x384   : > { %2888 = vmatprep.subr.bf16.mxu0 %v3134_v4 }
 0x387   : > { %2889 = vmatpush3.bf16.msra.mxu0 %v3134_v4 }
 0x388   : > { %2890 = vmatprep.subr.bf16.mxu0 %v3135_v5 }
 0x38b   : > { %2891 = vmatpush3.bf16.msra.mxu0 %v3135_v5 }
 0x38c   : > { %2892 = vmatprep.subr.bf16.mxu0 %v3136_v54 }
 0x38f   : > { %2893 = vmatpush3.bf16.msra.mxu0 %v3136_v54 }
 0x390   : > { %2894 = vmatprep.subr.bf16.mxu0 %v3137_v6 }
 0x393   : > { %2895 = vmatpush3.bf16.msra.mxu0 %v3137_v6 }
 0x394   : > { %2896 = vmatprep.subr.bf16.mxu0 %v3138_v7 }
 0x397   : > { %2897 = vmatpush3.bf16.msra.mxu0 %v3138_v7 }
 0x39a   : > { %2899 = vmatmul.mubr.bf16.vlgmr.msra.gmra.mrb[20].mxu0 %v3657_v53  ;;  %v2459_v53 = vld [vmem:[%s3951_s6 + $0x4] ss:$0 sm:$0xff] }
 0x44d   : > { %v2860_v11 = vpop.f32.mrb[16].mxu0 }
 0x44e   : > { %v1497_v12 = vadd.f32 %v2860_v11, %v2459_v53  ;;  %v1488_v13 = vpop.f32.mrb[17].mxu0 }
 0x44f   : > { %v1489_v14 = vadd.f32 %v2459_v53, %v1488_v13  ;;  %v2861_v15 = vpop.f32.mrb[18].mxu0 }
 0x450   : > { %v1500_v16 = vadd.f32 %v2861_v15, %v2459_v53  ;;  %v1491_v17 = vpop.f32.mrb[19].mxu0  ;;  %v1505_v19 = vmax.f32 %v1497_v12, 0.0 }
 0x451   : > { %v1492_v18 = vadd.f32 %v2459_v53, %v1491_v17  ;;  %v1503_v21 = vmax.f32 %v1489_v14, 0.0 }
 0x452   : > { %v1506_v20 = vmax.f32 %v1500_v16, 0.0 }
 0x453   : > { %v1504_v22 = vmax.f32 %v1492_v18, 0.0 }
 0x454   : > { %v1752_v23 = vpack.c.bf16 %v1506_v20, %v1505_v19 }
 0x455   : > { %v1751_v24 = vpack.c.bf16 %v1504_v22, %v1503_v21 }
 0x457   : > { %2922 = vmatprep.mubr.msk.bf16.mxu1 %vm1795_vm0, %v1751_v24 }
 0x458   : > { %2923 = vmatmul.mubr.msk.bf16.vlgmr.msra.gmra.mrb[16].mxu1 %vm1795_vm0, %v1752_v23 }
 0x459   : > { %2927 = vmatpush3.bf16.msra.mxu1 %v3143_v10 }
 0x45a   : > { %2928 = vmatprep.subr.bf16.mxu1 %v3144_v25 }
 0x45d   : > { %2929 = vmatpush3.bf16.msra.mxu1 %v3144_v25 }
 0x45e   : > { %2930 = vmatprep.subr.bf16.mxu1 %v3145_v26 }
 0x461   : > { %2931 = vmatpush3.bf16.msra.mxu1 %v3145_v26 }
 0x462   : > { %2932 = vmatprep.subr.bf16.mxu1 %v3146_v27 }
 0x465   : > { %2933 = vmatpush3.bf16.msra.mxu1 %v3146_v27 }
 0x46d   : > { %v2900_v29 = vpop.f32.mrb[20].mxu0 }
 0x46e   : > { %v1741_v30 = vadd.f32 %v2900_v29, %v2509_v28  ;;  %v1732_v31 = vpop.f32.mrb[21].mxu0 }
 0x46f   : > { %v1733_v32 = vadd.f32 %v2509_v28, %v1732_v31  ;;  %v2901_v33 = vpop.f32.mrb[22].mxu0 }
 0x470   : > { %v1744_v34 = vadd.f32 %v2901_v33, %v2509_v28  ;;  %v1735_v35 = vpop.f32.mrb[23].mxu0  ;;  %v1749_v37 = vmax.f32 %v1741_v30, 0.0 }
 0x471   : > { %v1736_v36 = vadd.f32 %v2509_v28, %v1735_v35  ;;  %v1747_v39 = vmax.f32 %v1733_v32, 0.0 }
 0x472   : > { %v1750_v38 = vmax.f32 %v1744_v34, 0.0 }
 0x473   : > { %v1748_v40 = vmax.f32 %v1736_v36, 0.0 }
 0x474   : > { %v1931_v41 = vpack.c.bf16 %v1750_v38, %v1749_v37 }
 0x475   : > { %v1930_v42 = vpack.c.bf16 %v1748_v40, %v1747_v39 }
 0x477   : > { %2934 = vmatprep.mubr.msk.bf16.mxu1 %vm1795_vm0, %v1930_v42 }
 0x478   : > { %2935 = vmatmul.mubr.msk.bf16.vlgmr.msra.gmra.mrb[16].mxu1 %vm1795_vm0, %v1931_v41 }
 0x479   : > { %3246 = shalt.err (!%p3243_p9)
}
 0x47a   : > { %s3247_s17 = scalar_lea.hbm %s3826_s26, 256  ;;  %s3251_s11 = scalar_lea.hbm %s3954_s9, 1024 }
 0x47b   : > { %p3248_p12 = scmp.ne.s32.totalorder %s3826_s26, %s3247_s17  ;;  %p3252_p10 = scmp.lt.u32.totalorder %s3826_s26, %s3954_s9 }
 0x47c   : > { %p3253_p1 = scmp.lt.u32.totalorder %s3251_s11, %s3247_s17  ;;  %p3255_p4 = scmp.lt.u32.totalorder %s3247_s17, %s3826_s26 }
 0x47d   : > { %p3249_p0 = pnand %p3248_p12, %p3552_p8 }
 0x47e   : > { %p3254_p2 = por %p3253_p1, %p3252_p10 }
 0x47f   : > { %p3250_p5 = pneg %p3249_p0 }
 0x480   : > { %p3256_p6 = por %p3255_p4, %p3254_p2 }
 0x482   : > { %p3257_p11 = pnand %p3256_p6, %p3250_p5 }
 0x484   : > { %3260 = shalt.err (!%p3257_p11)
}
 0x485   : > { %s3373_s1 = smov 64   ;;  %s3374_s23 = smov 4  }
 0x486   : > { %2961 = dma.vmem_to_hbm [thread:$0]  (%p3552_p8), %s3812_s13, 256, %s3826_s26, %s3828_s28, %s3373_s1, %s3373_s1, %s3374_s23  }
 0x487   : > { %s3859_s20 = scalar_lea.hbm %s3953_s8, %s3820_s27  ;;  %s2112_s11 = scalar_lea.sflag [#allocation4], %s3604_s29 }
 0x488   : > { %s3261_s0 = scalar_lea.vmem %s3816_s12, 256  ;;  %s3375_s18 = smov [#allocation8]  }
 0x489   : > { %p3262_p13 = scmp.ne.s32.totalorder %s3816_s12, %s3261_s0  ;;  %s3265_s2 = sshll.u32 %s3375_s18, 4  ;;  %s3266_s2 = int_to_ptr.vmem [resolvable:$false] %s3265_s2 }
 0x48a   : > { %s3267_s3 = scalar_lea.vmem %s3266_s2, 512  ;;  %p3268_p9 = scmp.lt.s32.totalorder %s3816_s12, %s3266_s2 }
 0x48b   : > { %p3263_p3 = pnand %p3262_p13, %p3552_p8  ;;  %p3269_p12 = scmp.lt.s32.totalorder %s3267_s3, %s3261_s0 }
 0x48d   : > { %p3264_p7 = pneg %p3263_p3  ;;  %p3270_p0 = por %p3269_p12, %p3268_p9 }
 0x48f   : > { %p3271_p5 = pnand %p3270_p0, %p3264_p7 }
 0x491   : > { %3274 = shalt.err (!%p3271_p5)
}
 0x492   : > { %s3275_s13 = scalar_lea.hbm %s3859_s20, 256  ;;  %s3279_s21 = scalar_lea.hbm %s3953_s8, 1024 }
 0x493   : > { %p3276_p10 = scmp.ne.s32.totalorder %s3859_s20, %s3275_s13  ;;  %p3280_p4 = scmp.lt.u32.totalorder %s3859_s20, %s3953_s8 }
 0x494   : > { %p3281_p6 = scmp.lt.u32.totalorder %s3279_s21, %s3275_s13  ;;  %p3283_p13 = scmp.lt.u32.totalorder %s3275_s13, %s3859_s20 }
 0x495   : > { %p3277_p1 = pnand %p3276_p10, %p3552_p8 }
 0x496   : > { %p3282_p11 = por %p3281_p6, %p3280_p4 }
 0x497   : > { %p3278_p2 = pneg %p3277_p1 }
 0x498   : > { %p3284_p3 = por %p3283_p13, %p3282_p11 }
 0x49a   : > { %p3285_p7 = pnand %p3284_p3, %p3278_p2 }
 0x49c   : > { %3288 = shalt.err (!%p3285_p7)
}
 0x49d   : > { %2960 = dma.vmem_to_hbm [thread:$0]  (%p3552_p8), %s3816_s12, 256, %s3859_s20, %s2112_s11, %s3373_s1, %s3373_s1, %s3374_s23  }
 0x49e   : > { %s3892_s13 = scalar_lea.hbm %s3955_s10, %s3820_s27  ;;  %s3289_s26 = scalar_lea.vmem %s3814_s24, 256 }
 0x49f   : > { %p3290_p9 = scmp.ne.s32.totalorder %s3814_s24, %s3289_s26  ;;  %s3376_s17 = smov [#allocation11]  }
 0x4a0   : > { %s3293_s29 = sshll.u32 %s3376_s17, 4  ;;  %s3294_s29 = int_to_ptr.vmem [resolvable:$false] %s3293_s29 }
 0x4a1   : > { %p3291_p12 = pnand %p3290_p9, %p3552_p8  ;;  %s3295_s21 = scalar_lea.vmem %s3294_s29, 512 }
 0x4a2   : > { %p3296_p5 = scmp.lt.s32.totalorder %s3814_s24, %s3294_s29  ;;  %p3297_p10 = scmp.lt.s32.totalorder %s3295_s21, %s3289_s26 }
 0x4a3   : > { %p3292_p0 = pneg %p3291_p12 }
 0x4a4   : > { %p3298_p1 = por %p3297_p10, %p3296_p5 }
 0x4a6   : > { %p3299_p2 = pnand %p3298_p1, %p3292_p0 }
 0x4a8   : > { %3302 = shalt.err (!%p3299_p2)
}
 0x4a9   : > { %s3303_s12 = scalar_lea.hbm %s3892_s13, 256  ;;  %s3307_s11 = scalar_lea.hbm %s3955_s10, 1024 }
 0x4aa   : > { %p3304_p4 = scmp.ne.s32.totalorder %s3892_s13, %s3303_s12  ;;  %p3308_p13 = scmp.lt.u32.totalorder %s3892_s13, %s3955_s10 }
 0x4ab   : > { %p3309_p3 = scmp.lt.u32.totalorder %s3307_s11, %s3303_s12  ;;  %p3311_p9 = scmp.lt.u32.totalorder %s3303_s12, %s3892_s13 }
 0x4ac   : > { %p3305_p6 = pnand %p3304_p4, %p3552_p8 }
 0x4ad   : > { %p3310_p7 = por %p3309_p3, %p3308_p13 }
 0x4ae   : > { %p3306_p11 = pneg %p3305_p6 }
 0x4af   : > { %p3312_p12 = por %p3311_p9, %p3310_p7 }
 0x4b1   : > { %p3313_p0 = pnand %p3312_p12, %p3306_p11 }
 0x4b3   : > { %3316 = shalt.err (!%p3313_p0)
}
 0x4b4   : > { %2962 = dma.vmem_to_hbm [thread:$0]  (%p3552_p8), %s3814_s24, 256, %s3892_s13, %s3828_s28, %s3373_s1, %s3373_s1, %s3374_s23   ;;  %vm2047_vm1 = vcmask 60416  }
 0x4b5   : > { %v2536_v43 = vld [vmem:[%s3951_s6 + $0x7] ss:$0 sm:$0xff]  ;;  %s2380_s26 = sshll.u32 %s3996_s19, 2 }
 0x4b6   : > { %s462_s25 = scalar_lea.vmem %s3952_s7, %s2380_s26 }
 0x54b   : > { %v2936_v44 = vpop.f32.mrb[16].mxu1 }
 0x54c   : > { %v2029_v45 = vadd.f32 %v2936_v44, %v2536_v43  ;;  %v2004_v46 = vpop.f32.mrb[17].mxu1 }
 0x54d   : > { %v2027_v47 = vadd.f32 %v2536_v43, %v2004_v46  ;;  %v2937_v48 = vpop.f32.mrb[18].mxu1 }
 0x54e   : > { %v2568_v49 = vpack.c.bf16 %v2029_v45, %v2029_v45  ;;  %v2030_v50 = vadd.f32 %v2937_v48, %v2536_v43  ;;  %v2007_v51 = vpop.f32.mrb[19].mxu1 }
 0x54f   : > { %v2566_v52 = vpack.c.bf16 %v2027_v47, %v2027_v47  ;;  %v2028_v55 = vadd.f32 %v2536_v43, %v2007_v51 }
 0x550   : > { %2050 = vst.msk [vmem:[%s462_s25 + $0x8] sm:$0xf] %vm2047_vm1, %v2568_v49  ;;  %v2569_v56 = vpack.c.bf16 %v2030_v50, %v2030_v50 }
 0x551   : > { %2048 = vst.msk [vmem:[%s462_s25] sm:$0xf] %vm2047_vm1, %v2566_v52  ;;  %v2567_v57 = vpack.c.bf16 %v2028_v55, %v2028_v55 }
 0x552   : > { %2051 = vst.msk [vmem:[%s462_s25 + $0xc] sm:$0xf] %vm2047_vm1, %v2569_v56 }
 0x553   : > { %2049 = vst.msk [vmem:[%s462_s25 + $0x4] sm:$0xf] %vm2047_vm1, %v2567_v57 }
 0x554 PF: > { %s3987_s19 = sld [smem:[#allocation16_spill]]  ;;  %s3988_s24 = sld [smem:[#allocation17_spill]] }
 0x555   : > { %p2992_p8 = scmp.ge.s32.totalorder %s3363_s16, 2 }
 0x55a   : > { %s2194_s28 = sand.u32 1, %s3987_s19   ;;  %p3989_p5 = scmp.ne.s32.totalorder %s3988_s24, 0 }
 0x55b   : > { %s2195_s1 = scalar_lea.sflag [#allocation4], %s2194_s28 }
 0x55c   : > { %p2978_p10 = pnand %p2992_p8, %p3989_p5 }
 0x55e   : > { %3342 = dma.done.wait (!%p2978_p10), %s2195_s1, 256  }
 0x55f   : > { %3344 = vsyncadd (!%p2978_p10), %s2195_s1, 4294967040  ;;  %s3990_s23 = sadd.s32 4294967294, %s3363_s16  }
 0x560   : > { %s2203_s13 = sand.u32 1, %s3990_s23  }
 0x561   : > { %s2204_s21 = scalar_lea.sflag [#allocation10], %s2203_s13 }
 0x562   : > { %3346 = dma.done.wait (!%p2978_p10), %s2204_s21, 512  }
 0x563   : > { %3348 = vsyncadd (!%p2978_p10), %s2204_s21, 4294966784  ;;  %p28_p1 = scmp.ge.s32.totalorder %s3539_s30, 6   ;;  %s3991_s13 = smov %s3355_s14 }
 0x564   : > { %s3992_s14 = smov %s3359_s15  ;;  %s3993_s15 = smov %s3548_s22 }
 0x565   : > { %s3994_s16 = smov %s3539_s30  ;;  %30 = sbr.rel (!%p28_p1) target bundleno = 13 (0xd), region = 150 }
 0x56c   :  { %2218 = vsyncpa [#allocation3], 1 }
 0x56d   :  { %2220 = vsyncpa [#allocation3 + $0x1], 1 }
 0x56e   :  { %2221 = vsyncpa [#allocation6], 1 }
 0x56f   :  { %2222 = vsyncpa [#allocation4], 1 }
 0x570   :  { %2224 = vsyncpa [#allocation4 + $0x1], 1 }
 0x571   :  { %2225 = vsyncpa [#allocation10], 1 }
 0x572   :  { %2227 = vsyncpa [#allocation10 + $0x1], 1 }

</bundles_post_ra>
